<compile_context>
chip_gen: v6e
topology: v6e:2x2x1
jax: 0.10.0
libtpu: 0.0.40
codegen_flags: <defaults>
</compile_context>

<pallas_src>
import math
from functools import partial

import jax
import jax.numpy as jnp
from jax.experimental import pallas as pl
from jax.experimental.pallas import tpu as pltpu

EPS_ENT = 1e-10   # entropy epsilon in the PyTorch module
LN_EPS = 1e-5     # nn.LayerNorm default eps


# ---------------------------------------------------------------------------
# Kernel A: one transformer-XL layer per batch row.  grid = (B,), "parallel".
# ---------------------------------------------------------------------------
def _layer_kernel(num_heads, head_dim, has_mem, *refs):
    idx = 0
    emb_ref = refs[idx]; idx += 1
    kmem_ref = vmem_ref = None
    if has_mem:
        kmem_ref = refs[idx]; idx += 1
        vmem_ref = refs[idx]; idx += 1
    (wq_ref, bq_ref, wk_ref, bk_ref, wv_ref, bv_ref, wo_ref, bo_ref,
     g1_ref, be1_ref, w1_ref, b1_ref, w2_ref, b2_ref,
     g2_ref, be2_ref) = refs[idx:idx + 16]
    idx += 16
    out_ref, ent_ref = refs[idx:idx + 2]

    x = emb_ref[0]                                        # [T, E] f32
    xb = x.astype(jnp.bfloat16)

    # QKV projections for the current tokens (weights pre-transposed [in,out]).
    q = jnp.dot(xb, wq_ref[...], preferred_element_type=jnp.float32) + bq_ref[...]
    kx = jnp.dot(xb, wk_ref[...], preferred_element_type=jnp.float32) + bk_ref[...]
    vx = jnp.dot(xb, wv_ref[...], preferred_element_type=jnp.float32) + bv_ref[...]
    q = q * (1.0 / math.sqrt(head_dim))                   # PyTorch MHA scales q

    if has_mem:
        km = kmem_ref[...]                                # [M, E] bf16 (precomputed)
        vm = vmem_ref[...]                                # [M, E] bf16

    hd = head_dim
    attn_acc = None
    ent_max = None
    # Statically unrolled head loop (small head counts).  The per-head column
    # slices are sub-128-lane relayouts; kept because a head-major transpose
    # costs an XLU relayout of the same data anyway at these head widths.
    for h in range(num_heads):
        lo = h * hd
        qh = q[:, lo:lo + hd].astype(jnp.bfloat16)        # [T, hd]
        kxh = kx[:, lo:lo + hd].astype(jnp.bfloat16)      # [T, hd]
        vxh = vx[:, lo:lo + hd].astype(jnp.bfloat16)      # [T, hd]

        # scores against the current tokens: q @ k^T without materializing k^T
        s_x = jax.lax.dot_general(qh, kxh, (((1,), (1,)), ((), ())),
                                  preferred_element_type=jnp.float32)   # [T, T]
        if has_mem:
            kmh = km[:, lo:lo + hd]                       # [M, hd] bf16
            vmh = vm[:, lo:lo + hd]                       # [M, hd] bf16
            s_m = jax.lax.dot_general(qh, kmh, (((1,), (1,)), ((), ())),
                                      preferred_element_type=jnp.float32)  # [T, M]
            m = jnp.maximum(jnp.max(s_m, axis=-1, keepdims=True),
                            jnp.max(s_x, axis=-1, keepdims=True))
            sm_m = s_m - m
            sm_x = s_x - m
            e_m = jnp.exp(sm_m)
            e_x = jnp.exp(sm_x)
            z = (jnp.sum(e_m, axis=-1, keepdims=True)
                 + jnp.sum(e_x, axis=-1, keepdims=True))
            ps = (jnp.sum(e_m * sm_m, axis=-1, keepdims=True)
                  + jnp.sum(e_x * sm_x, axis=-1, keepdims=True))
            ctx_un = (jnp.dot(e_m.astype(jnp.bfloat16), vmh,
                              preferred_element_type=jnp.float32)
                      + jnp.dot(e_x.astype(jnp.bfloat16), vxh,
                                preferred_element_type=jnp.float32))      # [T, hd]
        else:
            m = jnp.max(s_x, axis=-1, keepdims=True)
            sm_x = s_x - m
            e_x = jnp.exp(sm_x)
            z = jnp.sum(e_x, axis=-1, keepdims=True)
            ps = jnp.sum(e_x * sm_x, axis=-1, keepdims=True)
            ctx_un = jnp.dot(e_x.astype(jnp.bfloat16), vxh,
                             preferred_element_type=jnp.float32)          # [T, hd]

        rz = pl.reciprocal(z, approx=False)               # exact; z is only [T,1]
        # entropy identity: -sum p*log p == log z - sum(e*sm)/z  (eps omitted)
        ent_h = jnp.log(z) - ps * rz
        ent_max = ent_h if ent_max is None else jnp.maximum(ent_max, ent_h)

        ctx_h = ctx_un * rz                               # normalize after matmul
        # Fuse the output projection into the head loop (no head concat).
        contrib = jnp.dot(ctx_h.astype(jnp.bfloat16), wo_ref[h],
                          preferred_element_type=jnp.float32)             # [T, E]
        attn_acc = contrib if attn_acc is None else attn_acc + contrib

    attn_out = attn_acc + bo_ref[...]
    ent_ref[0] = ent_max.T                                # [1, T], max over heads

    def layer_norm(a, g, b):
        mu = jnp.mean(a, axis=-1, keepdims=True)
        c = a - mu
        var = jnp.mean(c * c, axis=-1, keepdims=True)
        return c * jax.lax.rsqrt(var + LN_EPS) * g + b

    x2 = layer_norm(x + attn_out, g1_ref[...], be1_ref[...])
    h1 = jnp.dot(x2.astype(jnp.bfloat16), w1_ref[...],
                 preferred_element_type=jnp.float32) + b1_ref[...]
    h1 = jnp.maximum(h1, 0.0)
    ff = jnp.dot(h1.astype(jnp.bfloat16), w2_ref[...],
                 preferred_element_type=jnp.float32) + b2_ref[...]
    out = layer_norm(x2 + ff, g2_ref[...], be2_ref[...])
    out_ref[...] = out.astype(jnp.bfloat16)               # bf16 slab for projection


# ---------------------------------------------------------------------------
# Kernel B: vocab projection.  grid = (NV,), "parallel" (fills both v7x TCs).
# The [B*T, E] activation slab is grid-invariant (one DMA); each (E, TV) wout
# tile is streamed exactly once; logits are stored in bf16 directly into the
# unpadded (B*T, V) output (ragged last tile handled by masked writeback).
# ---------------------------------------------------------------------------
def _vocab_proj_kernel(x_ref, w_ref, b_ref, o_ref):
    o_ref[...] = (jnp.dot(x_ref[...], w_ref[...],
                          preferred_element_type=jnp.float32)
                  + b_ref[...]).astype(o_ref.dtype)


def _vmem_budget_bytes():
    cap = 64 * 2**20                       # conservative fallback (v7x-sized)
    try:
        cap = int(getattr(pltpu.get_tpu_info(), "vmem_capacity_bytes", cap))
    except Exception:
        pass
    return int(cap * 0.85)                 # headroom below the physical limit


def _pick_vocab_tile(V, E, BT, budget):
    """Largest lane-dense vocab tile whose double-buffered footprint fits."""
    v128 = ((V + 127) // 128) * 128
    for tv in (2048, 1024, 512, 256, 128):
        if tv > v128:
            continue
        need = (2 * E * tv * 2             # wout tile, double-buffered, bf16
                + 2 * BT * tv * 2          # logits tile, double-buffered, bf16
                + 2 * BT * E * 2           # activation slab (2 buffers, bf16)
                + 2 * 8 * tv * 4           # bias tile (sublane-padded, f32)
                + (4 << 20))               # margin / compiler scratch
        if need <= budget:
            return tv
    return 128


def transformer_xl_forward(params, tokens, mem_x, mem_ent, *,
                           num_heads, mem_size, mode):
    """Forward pass equivalent to ImprovedTransformerXLModel.forward."""
    f32, bf16 = jnp.float32, jnp.bfloat16

    # TODO(synk): embedding gather and the top-k memory-retention glue stay in
    # plain XLA (tiny, data-dependent); only the heavy math runs in Pallas.
    emb = jnp.take(params['embed'], tokens, axis=0).astype(f32)   # [B, T, E]
    B, T, E = emb.shape
    hd = E // num_heads
    V = params['wout'].shape[0]
    has_mem = mem_x is not None
    M = mem_x.shape[0] if has_mem else 0
    S = M + T
    BT = B * T

    budget = _vmem_budget_bytes()

    # ---- weight prep (host, one-time): [in,out] layouts, bf16 MXU operands
    wq_t = params['wq'].T.astype(bf16)
    wk_t = params['wk'].T.astype(bf16)
    wv_t = params['wv'].T.astype(bf16)
    wo_h = params['wo'].T.reshape(num_heads, hd, E).astype(bf16)  # head-split rows
    w1_t = params['w1'].T.astype(bf16)
    w2_t = params['w2'].T.astype(bf16)
    bq = params['bq'][None, :].astype(f32)
    bk = params['bk'][None, :].astype(f32)
    bv = params['bv'][None, :].astype(f32)
    bo = params['bo'][None, :].astype(f32)
    b1 = params['b1'][None, :].astype(f32)
    b2 = params['b2'][None, :].astype(f32)
    g1 = params['g1'][None, :].astype(f32)
    be1 = params['be1'][None, :].astype(f32)
    g2 = params['g2'][None, :].astype(f32)
    be2 = params['be2'][None, :].astype(f32)

    # ---- memory K/V projected once per call (batch-invariant), reused in-kernel
    if has_mem:
        mem_f32 = mem_x.astype(f32)
        k_mem = (mem_f32 @ params['wk'].T + params['bk']).astype(bf16)   # [M, E]
        v_mem = (mem_f32 @ params['wv'].T + params['bv']).astype(bf16)   # [M, E]

    const_weights = [wq_t, bq, wk_t, bk, wv_t, bv, wo_h, bo,
                     g1, be1, w1_t, b1, w2_t, b2, g2, be2]

    def const_spec(a):
        nd = a.ndim
        return pl.BlockSpec(a.shape, lambda b, _nd=nd: (0,) * _nd)

    layer_inputs = [emb]
    layer_in_specs = [pl.BlockSpec((1, T, E), lambda b: (b, 0, 0))]
    if has_mem:
        layer_inputs += [k_mem, v_mem]
        layer_in_specs += [pl.BlockSpec((M, E), lambda b: (0, 0)),
                           pl.BlockSpec((M, E), lambda b: (0, 0))]
    layer_inputs += const_weights
    layer_in_specs += [const_spec(w) for w in const_weights]

    layer_out_specs = (pl.BlockSpec((T, E), lambda b: (b, 0)),      # bf16 slab rows
                       pl.BlockSpec((1, 1, T), lambda b: (b, 0, 0)))  # entropy
    layer_out_shape = (jax.ShapeDtypeStruct((BT, E), bf16),
                       jax.ShapeDtypeStruct((B, 1, T), f32))

    const_bytes = sum(int(w.size) * w.dtype.itemsize for w in const_weights)
    mem_in_bytes = 2 * M * E * 2 if has_mem else 0
    # Weights / mem K/V are grid-invariant but conservatively counted at 2
    # buffers each (default pipelining); plus activation blocks and margin.
    layer_need = 2 * (const_bytes + mem_in_bytes + T * E * 4 + T * E * 2 + T * 4) \
        + (6 << 20)
    layer_vmem = int(min(budget, max(layer_need, 24 << 20)))

    layer_flops = B * T * E * (24 * E + 4 * S)            # qkv + attn + o-proj + FF
    layer_tc = B * num_heads * T * (S + 2)                # exp per score + log/recip
    layer_bytes = (B * T * E * 4 + const_bytes + mem_in_bytes
                   + BT * E * 2 + B * T * 4)

    layer_out, ent = pl.pallas_call(
        partial(_layer_kernel, num_heads, hd, has_mem),
        out_shape=layer_out_shape,
        grid=(B,),
        in_specs=layer_in_specs,
        out_specs=layer_out_specs,
        compiler_params=pltpu.CompilerParams(
            dimension_semantics=("parallel",),
            vmem_limit_bytes=layer_vmem),
        cost_estimate=pl.CostEstimate(flops=int(layer_flops),
                                      transcendentals=int(layer_tc),
                                      bytes_accessed=int(layer_bytes)),
    )(*layer_inputs)

    # ---- vocab projection: stream wout tiles exactly once over a parallel grid
    TV = _pick_vocab_tile(V, E, BT, budget)
    NV = -(-V // TV)                       # cdiv
    V_pad = NV * TV                        # pad the weight/bias only
    wout_t = jnp.pad(params['wout'].T.astype(bf16), ((0, 0), (0, V_pad - V)))
    bout = jnp.pad(params['bout'].astype(f32), (0, V_pad - V))[None, :]

    proj_need = (2 * (E * TV * 2 + BT * TV * 2 + BT * E * 2)
                 + 2 * 8 * TV * 4 + (4 << 20))
    proj_vmem = int(min(budget, max(proj_need, 24 << 20)))
    proj_flops = 2 * BT * E * V_pad
    proj_bytes = BT * E * 2 + E * V_pad * 2 + V_pad * 4 + BT * V * 2

    logits_flat = pl.pallas_call(
        _vocab_proj_kernel,
        out_shape=jax.ShapeDtypeStruct((BT, V), bf16),    # bf16 logits, unpadded V
        grid=(NV,),
        in_specs=[pl.BlockSpec((BT, E), lambda j: (0, 0)),    # fetched once
                  pl.BlockSpec((E, TV), lambda j: (0, j)),    # streamed once total
                  pl.BlockSpec((1, TV), lambda j: (0, j))],
        out_specs=pl.BlockSpec((BT, TV), lambda j: (0, j)),
        compiler_params=pltpu.CompilerParams(
            dimension_semantics=("parallel",),
            vmem_limit_bytes=proj_vmem),
        cost_estimate=pl.CostEstimate(flops=int(proj_flops), transcendentals=0,
                                      bytes_accessed=int(proj_bytes)),
    )(layer_out, wout_t, bout)

    logits = logits_flat.reshape(B, T, V)   # contiguous reshape: no extra copy

    # ---- memory update (cheap glue; matches PyTorch semantics) ---------------
    ent_tok = ent[0, 0]                     # [T]  max-over-heads entropy, batch 0
    x_det = emb[0]                          # [T, E] (detach is a no-op here)
    if not has_mem:
        mem_x_new, mem_ent_new = x_det, ent_tok
    else:
        mem_x_new = jnp.concatenate([mem_x, x_det], axis=0)
        mem_ent_new = jnp.concatenate([mem_ent, ent_tok], axis=0)

    if mem_x_new.shape[0] > mem_size:
        if mode == 'entropy':
            scores = mem_ent_new
        else:
            scores = jnp.sqrt(jnp.sum(mem_x_new * mem_x_new, axis=1))
        total = scores.sum() + EPS_ENT
        kept_vals, idx = jax.lax.top_k(scores, mem_size)
        ratio = kept_vals.sum() / total
        mem_x_new = mem_x_new[idx]
        mem_ent_new = mem_ent_new[idx]
    else:
        ratio = jnp.float32(1.0)

    return logits, mem_x_new, mem_ent_new, ratio


def init_params(key, vocab_size, embed_dim):
    """Deterministic synthetic parameters (shapes match the PyTorch module)."""
    E = embed_dim
    ks = jax.random.split(key, 8)
    scale = 0.02

    def rnd(k, shape):
        return (jax.random.normal(k, shape) * scale).astype(jnp.float32)

    return dict(
        embed=rnd(ks[0], (vocab_size, E)),
        # nn.MultiheadAttention in_proj split into q/k/v ([E,E] each) + biases
        wq=rnd(ks[1], (E, E)), wk=rnd(ks[2], (E, E)), wv=rnd(ks[3], (E, E)),
        bq=jnp.zeros((E,), jnp.float32),
        bk=jnp.zeros((E,), jnp.float32),
        bv=jnp.zeros((E,), jnp.float32),
        wo=rnd(ks[4], (E, E)), bo=jnp.zeros((E,), jnp.float32),
        g1=jnp.ones((E,), jnp.float32), be1=jnp.zeros((E,), jnp.float32),
        w1=rnd(ks[5], (4 * E, E)), b1=jnp.zeros((4 * E,), jnp.float32),
        w2=rnd(ks[6], (E, 4 * E)), b2=jnp.zeros((E,), jnp.float32),
        g2=jnp.ones((E,), jnp.float32), be2=jnp.zeros((E,), jnp.float32),
        wout=rnd(ks[7], (vocab_size, E)),
        bout=jnp.zeros((vocab_size,), jnp.float32),
    )


if __name__ == "__main__":
    vocab_size, embed_dim, num_heads = 50, 32, 4
    mem_size, mode = 16, 'entropy'
    B, T = 2, 8

    key = jax.random.PRNGKey(0)
    pkey, k1, k2, k3 = jax.random.split(key, 4)
    params = init_params(pkey, vocab_size, embed_dim)

    mem_x, mem_ent = None, None
    logits, ratio = None, None
    # Three steps: (1) mem=None path, (2) mem-concat path, (3) top-k retention.
    for dk in (k1, k2, k3):
        tokens = jax.random.randint(dk, (B, T), 0, vocab_size)
        logits, mem_x, mem_ent, ratio = transformer_xl_forward(
            params, tokens, mem_x, mem_ent,
            num_heads=num_heads, mem_size=mem_size, mode=mode)

    jax.block_until_ready((logits, mem_x, mem_ent, ratio))
    assert logits.shape == (B, T, vocab_size)
    assert mem_x.shape == (mem_size, embed_dim)
    assert mem_ent.shape == (mem_size,)
    assert bool(jnp.all(jnp.isfinite(logits.astype(jnp.float32))))
    print("KERNEL_OK")
</pallas_src>

<mosaic_0001>
module attributes {stable_mosaic.version = 11 : i64} {
  func.func @_layer_kernel(%arg0: i32, %arg1: memref<1x8x32xf32, #tpu.memory_space<vmem>>, %arg2: memref<32x32xbf16, #tpu.memory_space<vmem>>, %arg3: memref<1x32xf32, #tpu.memory_space<vmem>>, %arg4: memref<32x32xbf16, #tpu.memory_space<vmem>>, %arg5: memref<1x32xf32, #tpu.memory_space<vmem>>, %arg6: memref<32x32xbf16, #tpu.memory_space<vmem>>, %arg7: memref<1x32xf32, #tpu.memory_space<vmem>>, %arg8: memref<4x8x32xbf16, #tpu.memory_space<vmem>>, %arg9: memref<1x32xf32, #tpu.memory_space<vmem>>, %arg10: memref<1x32xf32, #tpu.memory_space<vmem>>, %arg11: memref<1x32xf32, #tpu.memory_space<vmem>>, %arg12: memref<32x128xbf16, #tpu.memory_space<vmem>>, %arg13: memref<1x128xf32, #tpu.memory_space<vmem>>, %arg14: memref<128x32xbf16, #tpu.memory_space<vmem>>, %arg15: memref<1x32xf32, #tpu.memory_space<vmem>>, %arg16: memref<1x32xf32, #tpu.memory_space<vmem>>, %arg17: memref<1x32xf32, #tpu.memory_space<vmem>>, %arg18: memref<8x32xbf16, #tpu.memory_space<vmem>>, %arg19: memref<1x1x8xf32, #tpu.memory_space<vmem>>) attributes {dimension_semantics = [#tpu.dimension_semantics<parallel>], iteration_bounds = array<i64: 2>, scalar_prefetch = 0 : i64, scratch_operands = 0 : i64, tpu.core_type = #tpu.core_type<tc>, window_params = [{transform_indices = @transform_0, window_bounds = array<i64: 1, 8, 32>}, {pipeline_mode = #tpu.pipeline_mode<synchronous>, transform_indices = @transform_1, window_bounds = array<i64: 32, 32>}, {pipeline_mode = #tpu.pipeline_mode<synchronous>, transform_indices = @transform_2, window_bounds = array<i64: 1, 32>}, {pipeline_mode = #tpu.pipeline_mode<synchronous>, transform_indices = @transform_3, window_bounds = array<i64: 32, 32>}, {pipeline_mode = #tpu.pipeline_mode<synchronous>, transform_indices = @transform_4, window_bounds = array<i64: 1, 32>}, {pipeline_mode = #tpu.pipeline_mode<synchronous>, transform_indices = @transform_5, window_bounds = array<i64: 32, 32>}, {pipeline_mode = #tpu.pipeline_mode<synchronous>, transform_indices = @transform_6, window_bounds = array<i64: 1, 32>}, {pipeline_mode = #tpu.pipeline_mode<synchronous>, transform_indices = @transform_7, window_bounds = array<i64: 4, 8, 32>}, {pipeline_mode = #tpu.pipeline_mode<synchronous>, transform_indices = @transform_8, window_bounds = array<i64: 1, 32>}, {pipeline_mode = #tpu.pipeline_mode<synchronous>, transform_indices = @transform_9, window_bounds = array<i64: 1, 32>}, {pipeline_mode = #tpu.pipeline_mode<synchronous>, transform_indices = @transform_10, window_bounds = array<i64: 1, 32>}, {pipeline_mode = #tpu.pipeline_mode<synchronous>, transform_indices = @transform_11, window_bounds = array<i64: 32, 128>}, {pipeline_mode = #tpu.pipeline_mode<synchronous>, transform_indices = @transform_12, window_bounds = array<i64: 1, 128>}, {pipeline_mode = #tpu.pipeline_mode<synchronous>, transform_indices = @transform_13, window_bounds = array<i64: 128, 32>}, {pipeline_mode = #tpu.pipeline_mode<synchronous>, transform_indices = @transform_14, window_bounds = array<i64: 1, 32>}, {pipeline_mode = #tpu.pipeline_mode<synchronous>, transform_indices = @transform_15, window_bounds = array<i64: 1, 32>}, {pipeline_mode = #tpu.pipeline_mode<synchronous>, transform_indices = @transform_16, window_bounds = array<i64: 1, 32>}, {transform_indices = @transform_17, window_bounds = array<i64: 8, 32>}, {transform_indices = @transform_18, window_bounds = array<i64: 1, 1, 8>}]} {
    %c0 = arith.constant 0 : index
    %c0_0 = arith.constant 0 : index
    %c0_1 = arith.constant 0 : index
    %0 = vector.load %arg1[%c0, %c0_0, %c0_1] : memref<1x8x32xf32, #tpu.memory_space<vmem>>, vector<1x8x32xf32>
    %1 = vector.shape_cast %0 : vector<1x8x32xf32> to vector<8x32xf32>
    %2 = arith.truncf %1 : vector<8x32xf32> to vector<8x32xbf16>
    %c0_2 = arith.constant 0 : index
    %c0_3 = arith.constant 0 : index
    %3 = vector.load %arg2[%c0_2, %c0_3] : memref<32x32xbf16, #tpu.memory_space<vmem>>, vector<32x32xbf16>
    %cst = arith.constant dense<0.000000e+00> : vector<8x32xf32>
    %4 = tpu.matmul %2, %3, %cst {dimension_numbers = #tpu.dot_dimension_numbers<[1], [0], [0], [1], [0, 0, 1, 1], [], []>} : vector<8x32xbf16>, vector<32x32xbf16>, vector<8x32xf32> -> vector<8x32xf32>
    %c0_4 = arith.constant 0 : index
    %c0_5 = arith.constant 0 : index
    %5 = vector.load %arg3[%c0_4, %c0_5] : memref<1x32xf32, #tpu.memory_space<vmem>>, vector<1x32xf32>
    %6 = vector.broadcast %5 : vector<1x32xf32> to vector<8x32xf32>
    %7 = arith.addf %4, %6 : vector<8x32xf32>
    %c0_6 = arith.constant 0 : index
    %c0_7 = arith.constant 0 : index
    %8 = vector.load %arg4[%c0_6, %c0_7] : memref<32x32xbf16, #tpu.memory_space<vmem>>, vector<32x32xbf16>
    %cst_8 = arith.constant dense<0.000000e+00> : vector<8x32xf32>
    %9 = tpu.matmul %2, %8, %cst_8 {dimension_numbers = #tpu.dot_dimension_numbers<[1], [0], [0], [1], [0, 0, 1, 1], [], []>} : vector<8x32xbf16>, vector<32x32xbf16>, vector<8x32xf32> -> vector<8x32xf32>
    %c0_9 = arith.constant 0 : index
    %c0_10 = arith.constant 0 : index
    %10 = vector.load %arg5[%c0_9, %c0_10] : memref<1x32xf32, #tpu.memory_space<vmem>>, vector<1x32xf32>
    %11 = vector.broadcast %10 : vector<1x32xf32> to vector<8x32xf32>
    %12 = arith.addf %9, %11 : vector<8x32xf32>
    %c0_11 = arith.constant 0 : index
    %c0_12 = arith.constant 0 : index
    %13 = vector.load %arg6[%c0_11, %c0_12] : memref<32x32xbf16, #tpu.memory_space<vmem>>, vector<32x32xbf16>
    %cst_13 = arith.constant dense<0.000000e+00> : vector<8x32xf32>
    %14 = tpu.matmul %2, %13, %cst_13 {dimension_numbers = #tpu.dot_dimension_numbers<[1], [0], [0], [1], [0, 0, 1, 1], [], []>} : vector<8x32xbf16>, vector<32x32xbf16>, vector<8x32xf32> -> vector<8x32xf32>
    %c0_14 = arith.constant 0 : index
    %c0_15 = arith.constant 0 : index
    %15 = vector.load %arg7[%c0_14, %c0_15] : memref<1x32xf32, #tpu.memory_space<vmem>>, vector<1x32xf32>
    %16 = vector.broadcast %15 : vector<1x32xf32> to vector<8x32xf32>
    %17 = arith.addf %14, %16 : vector<8x32xf32>
    %cst_16 = arith.constant 0.353553385 : f32
    %18 = vector.broadcast %cst_16 : f32 to vector<8x32xf32>
    %19 = arith.mulf %7, %18 : vector<8x32xf32>
    %20 = vector.extract_strided_slice %19 {offsets = [0, 0], sizes = [8, 8], strides = [1, 1]} : vector<8x32xf32> to vector<8x8xf32>
    %21 = arith.truncf %20 : vector<8x8xf32> to vector<8x8xbf16>
    %22 = vector.extract_strided_slice %12 {offsets = [0, 0], sizes = [8, 8], strides = [1, 1]} : vector<8x32xf32> to vector<8x8xf32>
    %23 = arith.truncf %22 : vector<8x8xf32> to vector<8x8xbf16>
    %24 = vector.extract_strided_slice %17 {offsets = [0, 0], sizes = [8, 8], strides = [1, 1]} : vector<8x32xf32> to vector<8x8xf32>
    %25 = arith.truncf %24 : vector<8x8xf32> to vector<8x8xbf16>
    %cst_17 = arith.constant dense<0.000000e+00> : vector<8x8xf32>
    %26 = tpu.matmul %21, %23, %cst_17 {dimension_numbers = #tpu.dot_dimension_numbers<[1], [1], [0], [0], [0, 0, 1, 0], [], []>} : vector<8x8xbf16>, vector<8x8xbf16>, vector<8x8xf32> -> vector<8x8xf32>
    %cst_18 = arith.constant dense<0xFF800000> : vector<8xf32>
    %27 = vector.multi_reduction <maximumf>, %26, %cst_18 [1] : vector<8x8xf32> to vector<8xf32>
    %28 = vector.shape_cast %27 : vector<8xf32> to vector<8x1xf32>
    %29 = vector.broadcast %28 : vector<8x1xf32> to vector<8x8xf32>
    %30 = arith.subf %26, %29 : vector<8x8xf32>
    %31 = math.exp %30 : vector<8x8xf32>
    %cst_19 = arith.constant dense<0.000000e+00> : vector<8xf32>
    %32 = vector.multi_reduction <add>, %31, %cst_19 [1] : vector<8x8xf32> to vector<8xf32>
    %33 = vector.shape_cast %32 : vector<8xf32> to vector<8x1xf32>
    %34 = arith.mulf %31, %30 : vector<8x8xf32>
    %cst_20 = arith.constant dense<0.000000e+00> : vector<8xf32>
    %35 = vector.multi_reduction <add>, %34, %cst_20 [1] : vector<8x8xf32> to vector<8xf32>
    %36 = vector.shape_cast %35 : vector<8xf32> to vector<8x1xf32>
    %37 = arith.truncf %31 : vector<8x8xf32> to vector<8x8xbf16>
    %cst_21 = arith.constant dense<0.000000e+00> : vector<8x8xf32>
    %38 = tpu.matmul %37, %25, %cst_21 {dimension_numbers = #tpu.dot_dimension_numbers<[1], [0], [0], [1], [0, 0, 1, 1], [], []>} : vector<8x8xbf16>, vector<8x8xbf16>, vector<8x8xf32> -> vector<8x8xf32>
    %39 = tpu.reciprocal %33 : vector<8x1xf32> -> vector<8x1xf32>
    %40 = math.log %33 : vector<8x1xf32>
    %41 = arith.mulf %36, %39 : vector<8x1xf32>
    %42 = arith.subf %40, %41 : vector<8x1xf32>
    %43 = vector.broadcast %39 : vector<8x1xf32> to vector<8x8xf32>
    %44 = arith.mulf %38, %43 : vector<8x8xf32>
    %45 = arith.truncf %44 : vector<8x8xf32> to vector<8x8xbf16>
    %c0_22 = arith.constant 0 : index
    %c0_23 = arith.constant 0 : index
    %c0_24 = arith.constant 0 : index
    %46 = vector.load %arg8[%c0_22, %c0_23, %c0_24] : memref<4x8x32xbf16, #tpu.memory_space<vmem>>, vector<1x8x32xbf16>
    %47 = vector.shape_cast %46 : vector<1x8x32xbf16> to vector<8x32xbf16>
    %cst_25 = arith.constant dense<0.000000e+00> : vector<8x32xf32>
    %48 = tpu.matmul %45, %47, %cst_25 {dimension_numbers = #tpu.dot_dimension_numbers<[1], [0], [0], [1], [0, 0, 1, 1], [], []>} : vector<8x8xbf16>, vector<8x32xbf16>, vector<8x32xf32> -> vector<8x32xf32>
    %49 = vector.extract_strided_slice %19 {offsets = [0, 8], sizes = [8, 8], strides = [1, 1]} : vector<8x32xf32> to vector<8x8xf32>
    %50 = arith.truncf %49 : vector<8x8xf32> to vector<8x8xbf16>
    %51 = vector.extract_strided_slice %12 {offsets = [0, 8], sizes = [8, 8], strides = [1, 1]} : vector<8x32xf32> to vector<8x8xf32>
    %52 = arith.truncf %51 : vector<8x8xf32> to vector<8x8xbf16>
    %53 = vector.extract_strided_slice %17 {offsets = [0, 8], sizes = [8, 8], strides = [1, 1]} : vector<8x32xf32> to vector<8x8xf32>
    %54 = arith.truncf %53 : vector<8x8xf32> to vector<8x8xbf16>
    %cst_26 = arith.constant dense<0.000000e+00> : vector<8x8xf32>
    %55 = tpu.matmul %50, %52, %cst_26 {dimension_numbers = #tpu.dot_dimension_numbers<[1], [1], [0], [0], [0, 0, 1, 0], [], []>} : vector<8x8xbf16>, vector<8x8xbf16>, vector<8x8xf32> -> vector<8x8xf32>
    %cst_27 = arith.constant dense<0xFF800000> : vector<8xf32>
    %56 = vector.multi_reduction <maximumf>, %55, %cst_27 [1] : vector<8x8xf32> to vector<8xf32>
    %57 = vector.shape_cast %56 : vector<8xf32> to vector<8x1xf32>
    %58 = vector.broadcast %57 : vector<8x1xf32> to vector<8x8xf32>
    %59 = arith.subf %55, %58 : vector<8x8xf32>
    %60 = math.exp %59 : vector<8x8xf32>
    %cst_28 = arith.constant dense<0.000000e+00> : vector<8xf32>
    %61 = vector.multi_reduction <add>, %60, %cst_28 [1] : vector<8x8xf32> to vector<8xf32>
    %62 = vector.shape_cast %61 : vector<8xf32> to vector<8x1xf32>
    %63 = arith.mulf %60, %59 : vector<8x8xf32>
    %cst_29 = arith.constant dense<0.000000e+00> : vector<8xf32>
    %64 = vector.multi_reduction <add>, %63, %cst_29 [1] : vector<8x8xf32> to vector<8xf32>
    %65 = vector.shape_cast %64 : vector<8xf32> to vector<8x1xf32>
    %66 = arith.truncf %60 : vector<8x8xf32> to vector<8x8xbf16>
    %cst_30 = arith.constant dense<0.000000e+00> : vector<8x8xf32>
    %67 = tpu.matmul %66, %54, %cst_30 {dimension_numbers = #tpu.dot_dimension_numbers<[1], [0], [0], [1], [0, 0, 1, 1], [], []>} : vector<8x8xbf16>, vector<8x8xbf16>, vector<8x8xf32> -> vector<8x8xf32>
    %68 = tpu.reciprocal %62 : vector<8x1xf32> -> vector<8x1xf32>
    %69 = math.log %62 : vector<8x1xf32>
    %70 = arith.mulf %65, %68 : vector<8x1xf32>
    %71 = arith.subf %69, %70 : vector<8x1xf32>
    %72 = arith.maximumf %42, %71 : vector<8x1xf32>
    %73 = vector.broadcast %68 : vector<8x1xf32> to vector<8x8xf32>
    %74 = arith.mulf %67, %73 : vector<8x8xf32>
    %75 = arith.truncf %74 : vector<8x8xf32> to vector<8x8xbf16>
    %c1 = arith.constant 1 : index
    %c0_31 = arith.constant 0 : index
    %c0_32 = arith.constant 0 : index
    %76 = vector.load %arg8[%c1, %c0_31, %c0_32] : memref<4x8x32xbf16, #tpu.memory_space<vmem>>, vector<1x8x32xbf16>
    %77 = vector.shape_cast %76 : vector<1x8x32xbf16> to vector<8x32xbf16>
    %cst_33 = arith.constant dense<0.000000e+00> : vector<8x32xf32>
    %78 = tpu.matmul %75, %77, %cst_33 {dimension_numbers = #tpu.dot_dimension_numbers<[1], [0], [0], [1], [0, 0, 1, 1], [], []>} : vector<8x8xbf16>, vector<8x32xbf16>, vector<8x32xf32> -> vector<8x32xf32>
    %79 = arith.addf %48, %78 : vector<8x32xf32>
    %80 = vector.extract_strided_slice %19 {offsets = [0, 16], sizes = [8, 8], strides = [1, 1]} : vector<8x32xf32> to vector<8x8xf32>
    %81 = arith.truncf %80 : vector<8x8xf32> to vector<8x8xbf16>
    %82 = vector.extract_strided_slice %12 {offsets = [0, 16], sizes = [8, 8], strides = [1, 1]} : vector<8x32xf32> to vector<8x8xf32>
    %83 = arith.truncf %82 : vector<8x8xf32> to vector<8x8xbf16>
    %84 = vector.extract_strided_slice %17 {offsets = [0, 16], sizes = [8, 8], strides = [1, 1]} : vector<8x32xf32> to vector<8x8xf32>
    %85 = arith.truncf %84 : vector<8x8xf32> to vector<8x8xbf16>
    %cst_34 = arith.constant dense<0.000000e+00> : vector<8x8xf32>
    %86 = tpu.matmul %81, %83, %cst_34 {dimension_numbers = #tpu.dot_dimension_numbers<[1], [1], [0], [0], [0, 0, 1, 0], [], []>} : vector<8x8xbf16>, vector<8x8xbf16>, vector<8x8xf32> -> vector<8x8xf32>
    %cst_35 = arith.constant dense<0xFF800000> : vector<8xf32>
    %87 = vector.multi_reduction <maximumf>, %86, %cst_35 [1] : vector<8x8xf32> to vector<8xf32>
    %88 = vector.shape_cast %87 : vector<8xf32> to vector<8x1xf32>
    %89 = vector.broadcast %88 : vector<8x1xf32> to vector<8x8xf32>
    %90 = arith.subf %86, %89 : vector<8x8xf32>
    %91 = math.exp %90 : vector<8x8xf32>
    %cst_36 = arith.constant dense<0.000000e+00> : vector<8xf32>
    %92 = vector.multi_reduction <add>, %91, %cst_36 [1] : vector<8x8xf32> to vector<8xf32>
    %93 = vector.shape_cast %92 : vector<8xf32> to vector<8x1xf32>
    %94 = arith.mulf %91, %90 : vector<8x8xf32>
    %cst_37 = arith.constant dense<0.000000e+00> : vector<8xf32>
    %95 = vector.multi_reduction <add>, %94, %cst_37 [1] : vector<8x8xf32> to vector<8xf32>
    %96 = vector.shape_cast %95 : vector<8xf32> to vector<8x1xf32>
    %97 = arith.truncf %91 : vector<8x8xf32> to vector<8x8xbf16>
    %cst_38 = arith.constant dense<0.000000e+00> : vector<8x8xf32>
    %98 = tpu.matmul %97, %85, %cst_38 {dimension_numbers = #tpu.dot_dimension_numbers<[1], [0], [0], [1], [0, 0, 1, 1], [], []>} : vector<8x8xbf16>, vector<8x8xbf16>, vector<8x8xf32> -> vector<8x8xf32>
    %99 = tpu.reciprocal %93 : vector<8x1xf32> -> vector<8x1xf32>
    %100 = math.log %93 : vector<8x1xf32>
    %101 = arith.mulf %96, %99 : vector<8x1xf32>
    %102 = arith.subf %100, %101 : vector<8x1xf32>
    %103 = arith.maximumf %72, %102 : vector<8x1xf32>
    %104 = vector.broadcast %99 : vector<8x1xf32> to vector<8x8xf32>
    %105 = arith.mulf %98, %104 : vector<8x8xf32>
    %106 = arith.truncf %105 : vector<8x8xf32> to vector<8x8xbf16>
    %c2 = arith.constant 2 : index
    %c0_39 = arith.constant 0 : index
    %c0_40 = arith.constant 0 : index
    %107 = vector.load %arg8[%c2, %c0_39, %c0_40] : memref<4x8x32xbf16, #tpu.memory_space<vmem>>, vector<1x8x32xbf16>
    %108 = vector.shape_cast %107 : vector<1x8x32xbf16> to vector<8x32xbf16>
    %cst_41 = arith.constant dense<0.000000e+00> : vector<8x32xf32>
    %109 = tpu.matmul %106, %108, %cst_41 {dimension_numbers = #tpu.dot_dimension_numbers<[1], [0], [0], [1], [0, 0, 1, 1], [], []>} : vector<8x8xbf16>, vector<8x32xbf16>, vector<8x32xf32> -> vector<8x32xf32>
    %110 = arith.addf %79, %109 : vector<8x32xf32>
    %111 = vector.extract_strided_slice %19 {offsets = [0, 24], sizes = [8, 8], strides = [1, 1]} : vector<8x32xf32> to vector<8x8xf32>
    %112 = arith.truncf %111 : vector<8x8xf32> to vector<8x8xbf16>
    %113 = vector.extract_strided_slice %12 {offsets = [0, 24], sizes = [8, 8], strides = [1, 1]} : vector<8x32xf32> to vector<8x8xf32>
    %114 = arith.truncf %113 : vector<8x8xf32> to vector<8x8xbf16>
    %115 = vector.extract_strided_slice %17 {offsets = [0, 24], sizes = [8, 8], strides = [1, 1]} : vector<8x32xf32> to vector<8x8xf32>
    %116 = arith.truncf %115 : vector<8x8xf32> to vector<8x8xbf16>
    %cst_42 = arith.constant dense<0.000000e+00> : vector<8x8xf32>
    %117 = tpu.matmul %112, %114, %cst_42 {dimension_numbers = #tpu.dot_dimension_numbers<[1], [1], [0], [0], [0, 0, 1, 0], [], []>} : vector<8x8xbf16>, vector<8x8xbf16>, vector<8x8xf32> -> vector<8x8xf32>
    %cst_43 = arith.constant dense<0xFF800000> : vector<8xf32>
    %118 = vector.multi_reduction <maximumf>, %117, %cst_43 [1] : vector<8x8xf32> to vector<8xf32>
    %119 = vector.shape_cast %118 : vector<8xf32> to vector<8x1xf32>
    %120 = vector.broadcast %119 : vector<8x1xf32> to vector<8x8xf32>
    %121 = arith.subf %117, %120 : vector<8x8xf32>
    %122 = math.exp %121 : vector<8x8xf32>
    %cst_44 = arith.constant dense<0.000000e+00> : vector<8xf32>
    %123 = vector.multi_reduction <add>, %122, %cst_44 [1] : vector<8x8xf32> to vector<8xf32>
    %124 = vector.shape_cast %123 : vector<8xf32> to vector<8x1xf32>
    %125 = arith.mulf %122, %121 : vector<8x8xf32>
    %cst_45 = arith.constant dense<0.000000e+00> : vector<8xf32>
    %126 = vector.multi_reduction <add>, %125, %cst_45 [1] : vector<8x8xf32> to vector<8xf32>
    %127 = vector.shape_cast %126 : vector<8xf32> to vector<8x1xf32>
    %128 = arith.truncf %122 : vector<8x8xf32> to vector<8x8xbf16>
    %cst_46 = arith.constant dense<0.000000e+00> : vector<8x8xf32>
    %129 = tpu.matmul %128, %116, %cst_46 {dimension_numbers = #tpu.dot_dimension_numbers<[1], [0], [0], [1], [0, 0, 1, 1], [], []>} : vector<8x8xbf16>, vector<8x8xbf16>, vector<8x8xf32> -> vector<8x8xf32>
    %130 = tpu.reciprocal %124 : vector<8x1xf32> -> vector<8x1xf32>
    %131 = math.log %124 : vector<8x1xf32>
    %132 = arith.mulf %127, %130 : vector<8x1xf32>
    %133 = arith.subf %131, %132 : vector<8x1xf32>
    %134 = arith.maximumf %103, %133 : vector<8x1xf32>
    %135 = vector.broadcast %130 : vector<8x1xf32> to vector<8x8xf32>
    %136 = arith.mulf %129, %135 : vector<8x8xf32>
    %137 = arith.truncf %136 : vector<8x8xf32> to vector<8x8xbf16>
    %c3 = arith.constant 3 : index
    %c0_47 = arith.constant 0 : index
    %c0_48 = arith.constant 0 : index
    %138 = vector.load %arg8[%c3, %c0_47, %c0_48] : memref<4x8x32xbf16, #tpu.memory_space<vmem>>, vector<1x8x32xbf16>
    %139 = vector.shape_cast %138 : vector<1x8x32xbf16> to vector<8x32xbf16>
    %cst_49 = arith.constant dense<0.000000e+00> : vector<8x32xf32>
    %140 = tpu.matmul %137, %139, %cst_49 {dimension_numbers = #tpu.dot_dimension_numbers<[1], [0], [0], [1], [0, 0, 1, 1], [], []>} : vector<8x8xbf16>, vector<8x32xbf16>, vector<8x32xf32> -> vector<8x32xf32>
    %141 = arith.addf %110, %140 : vector<8x32xf32>
    %c0_50 = arith.constant 0 : index
    %c0_51 = arith.constant 0 : index
    %142 = vector.load %arg9[%c0_50, %c0_51] : memref<1x32xf32, #tpu.memory_space<vmem>>, vector<1x32xf32>
    %143 = vector.broadcast %142 : vector<1x32xf32> to vector<8x32xf32>
    %144 = arith.addf %141, %143 : vector<8x32xf32>
    %145 = tpu.transpose %134, [1, 0] : vector<8x1xf32> -> vector<1x8xf32>
    %c0_52 = arith.constant 0 : index
    %c0_53 = arith.constant 0 : index
    %c0_54 = arith.constant 0 : index
    %146 = vector.load %arg19[%c0_52, %c0_53, %c0_54] : memref<1x1x8xf32, #tpu.memory_space<vmem>>, vector<1x1x8xf32>
    %147 = vector.shape_cast %146 : vector<1x1x8xf32> to vector<1x8xf32>
    %148 = vector.shape_cast %145 : vector<1x8xf32> to vector<1x1x8xf32>
    tpu.vector_store %arg19[%c0_52, %c0_53, %c0_54], %148 {strides = array<i32>} : memref<1x1x8xf32, #tpu.memory_space<vmem>>, vector<1x1x8xf32>,
    %149 = arith.addf %1, %144 : vector<8x32xf32>
    %c0_55 = arith.constant 0 : index
    %c0_56 = arith.constant 0 : index
    %150 = vector.load %arg10[%c0_55, %c0_56] : memref<1x32xf32, #tpu.memory_space<vmem>>, vector<1x32xf32>
    %c0_57 = arith.constant 0 : index
    %c0_58 = arith.constant 0 : index
    %151 = vector.load %arg11[%c0_57, %c0_58] : memref<1x32xf32, #tpu.memory_space<vmem>>, vector<1x32xf32>
    %cst_59 = arith.constant dense<0.000000e+00> : vector<8xf32>
    %152 = vector.multi_reduction <add>, %149, %cst_59 [1] : vector<8x32xf32> to vector<8xf32>
    %153 = vector.shape_cast %152 : vector<8xf32> to vector<8x1xf32>
    %cst_60 = arith.constant 3.200000e+01 : f32
    %154 = vector.broadcast %cst_60 : f32 to vector<8x1xf32>
    %155 = arith.divf %153, %154 : vector<8x1xf32>
    %156 = vector.broadcast %155 : vector<8x1xf32> to vector<8x32xf32>
    %157 = arith.subf %149, %156 : vector<8x32xf32>
    %158 = arith.mulf %157, %157 : vector<8x32xf32>
    %cst_61 = arith.constant dense<0.000000e+00> : vector<8xf32>
    %159 = vector.multi_reduction <add>, %158, %cst_61 [1] : vector<8x32xf32> to vector<8xf32>
    %160 = vector.shape_cast %159 : vector<8xf32> to vector<8x1xf32>
    %cst_62 = arith.constant 3.200000e+01 : f32
    %161 = vector.broadcast %cst_62 : f32 to vector<8x1xf32>
    %162 = arith.divf %160, %161 : vector<8x1xf32>
    %cst_63 = arith.constant 9.99999974E-6 : f32
    %163 = vector.broadcast %cst_63 : f32 to vector<8x1xf32>
    %164 = arith.addf %162, %163 : vector<8x1xf32>
    %165 = math.rsqrt %164 : vector<8x1xf32>
    %166 = vector.broadcast %165 : vector<8x1xf32> to vector<8x32xf32>
    %167 = arith.mulf %157, %166 : vector<8x32xf32>
    %168 = vector.broadcast %150 : vector<1x32xf32> to vector<8x32xf32>
    %169 = arith.mulf %167, %168 : vector<8x32xf32>
    %170 = vector.broadcast %151 : vector<1x32xf32> to vector<8x32xf32>
    %171 = arith.addf %169, %170 : vector<8x32xf32>
    %172 = arith.truncf %171 : vector<8x32xf32> to vector<8x32xbf16>
    %c0_64 = arith.constant 0 : index
    %c0_65 = arith.constant 0 : index
    %173 = vector.load %arg12[%c0_64, %c0_65] : memref<32x128xbf16, #tpu.memory_space<vmem>>, vector<32x128xbf16>
    %cst_66 = arith.constant dense<0.000000e+00> : vector<8x128xf32>
    %174 = tpu.matmul %172, %173, %cst_66 {dimension_numbers = #tpu.dot_dimension_numbers<[1], [0], [0], [1], [0, 0, 1, 1], [], []>} : vector<8x32xbf16>, vector<32x128xbf16>, vector<8x128xf32> -> vector<8x128xf32>
    %c0_67 = arith.constant 0 : index
    %c0_68 = arith.constant 0 : index
    %175 = vector.load %arg13[%c0_67, %c0_68] : memref<1x128xf32, #tpu.memory_space<vmem>>, vector<1x128xf32>
    %176 = vector.broadcast %175 : vector<1x128xf32> to vector<8x128xf32>
    %177 = arith.addf %174, %176 : vector<8x128xf32>
    %cst_69 = arith.constant 0.000000e+00 : f32
    %178 = vector.broadcast %cst_69 : f32 to vector<8x128xf32>
    %179 = arith.maximumf %177, %178 : vector<8x128xf32>
    %180 = arith.truncf %179 : vector<8x128xf32> to vector<8x128xbf16>
    %c0_70 = arith.constant 0 : index
    %c0_71 = arith.constant 0 : index
    %181 = vector.load %arg14[%c0_70, %c0_71] : memref<128x32xbf16, #tpu.memory_space<vmem>>, vector<128x32xbf16>
    %cst_72 = arith.constant dense<0.000000e+00> : vector<8x32xf32>
    %182 = tpu.matmul %180, %181, %cst_72 {dimension_numbers = #tpu.dot_dimension_numbers<[1], [0], [0], [1], [0, 0, 1, 1], [], []>} : vector<8x128xbf16>, vector<128x32xbf16>, vector<8x32xf32> -> vector<8x32xf32>
    %c0_73 = arith.constant 0 : index
    %c0_74 = arith.constant 0 : index
    %183 = vector.load %arg15[%c0_73, %c0_74] : memref<1x32xf32, #tpu.memory_space<vmem>>, vector<1x32xf32>
    %184 = vector.broadcast %183 : vector<1x32xf32> to vector<8x32xf32>
    %185 = arith.addf %182, %184 : vector<8x32xf32>
    %186 = arith.addf %171, %185 : vector<8x32xf32>
    %c0_75 = arith.constant 0 : index
    %c0_76 = arith.constant 0 : index
    %187 = vector.load %arg16[%c0_75, %c0_76] : memref<1x32xf32, #tpu.memory_space<vmem>>, vector<1x32xf32>
    %c0_77 = arith.constant 0 : index
    %c0_78 = arith.constant 0 : index
    %188 = vector.load %arg17[%c0_77, %c0_78] : memref<1x32xf32, #tpu.memory_space<vmem>>, vector<1x32xf32>
    %cst_79 = arith.constant dense<0.000000e+00> : vector<8xf32>
    %189 = vector.multi_reduction <add>, %186, %cst_79 [1] : vector<8x32xf32> to vector<8xf32>
    %190 = vector.shape_cast %189 : vector<8xf32> to vector<8x1xf32>
    %cst_80 = arith.constant 3.200000e+01 : f32
    %191 = vector.broadcast %cst_80 : f32 to vector<8x1xf32>
    %192 = arith.divf %190, %191 : vector<8x1xf32>
    %193 = vector.broadcast %192 : vector<8x1xf32> to vector<8x32xf32>
    %194 = arith.subf %186, %193 : vector<8x32xf32>
    %195 = arith.mulf %194, %194 : vector<8x32xf32>
    %cst_81 = arith.constant dense<0.000000e+00> : vector<8xf32>
    %196 = vector.multi_reduction <add>, %195, %cst_81 [1] : vector<8x32xf32> to vector<8xf32>
    %197 = vector.shape_cast %196 : vector<8xf32> to vector<8x1xf32>
    %cst_82 = arith.constant 3.200000e+01 : f32
    %198 = vector.broadcast %cst_82 : f32 to vector<8x1xf32>
    %199 = arith.divf %197, %198 : vector<8x1xf32>
    %cst_83 = arith.constant 9.99999974E-6 : f32
    %200 = vector.broadcast %cst_83 : f32 to vector<8x1xf32>
    %201 = arith.addf %199, %200 : vector<8x1xf32>
    %202 = math.rsqrt %201 : vector<8x1xf32>
    %203 = vector.broadcast %202 : vector<8x1xf32> to vector<8x32xf32>
    %204 = arith.mulf %194, %203 : vector<8x32xf32>
    %205 = vector.broadcast %187 : vector<1x32xf32> to vector<8x32xf32>
    %206 = arith.mulf %204, %205 : vector<8x32xf32>
    %207 = vector.broadcast %188 : vector<1x32xf32> to vector<8x32xf32>
    %208 = arith.addf %206, %207 : vector<8x32xf32>
    %209 = arith.truncf %208 : vector<8x32xf32> to vector<8x32xbf16>
    %c0_84 = arith.constant 0 : index
    %c0_85 = arith.constant 0 : index
    %210 = vector.load %arg18[%c0_84, %c0_85] : memref<8x32xbf16, #tpu.memory_space<vmem>>, vector<8x32xbf16>
    tpu.vector_store %arg18[%c0_84, %c0_85], %209 {strides = array<i32>} : memref<8x32xbf16, #tpu.memory_space<vmem>>, vector<8x32xbf16>,
    return
  }
  func.func @transform_0(%arg0: i32) -> (i32, i32, i32) {
    %c0_i32 = arith.constant 0 : i32
    %c0_i32_0 = arith.constant 0 : i32
    %c0_i32_1 = arith.constant 0 : i32
    return %arg0, %c0_i32, %c0_i32_0 : i32, i32, i32
  }
  func.func @transform_1(%arg0: i32) -> (i32, i32) {
    %c0_i32 = arith.constant 0 : i32
    %c0_i32_0 = arith.constant 0 : i32
    %c0_i32_1 = arith.constant 0 : i32
    return %c0_i32, %c0_i32_0 : i32, i32
  }
  func.func @transform_2(%arg0: i32) -> (i32, i32) {
    %c0_i32 = arith.constant 0 : i32
    %c0_i32_0 = arith.constant 0 : i32
    %c0_i32_1 = arith.constant 0 : i32
    return %c0_i32, %c0_i32_0 : i32, i32
  }
  func.func @transform_3(%arg0: i32) -> (i32, i32) {
    %c0_i32 = arith.constant 0 : i32
    %c0_i32_0 = arith.constant 0 : i32
    %c0_i32_1 = arith.constant 0 : i32
    return %c0_i32, %c0_i32_0 : i32, i32
  }
  func.func @transform_4(%arg0: i32) -> (i32, i32) {
    %c0_i32 = arith.constant 0 : i32
    %c0_i32_0 = arith.constant 0 : i32
    %c0_i32_1 = arith.constant 0 : i32
    return %c0_i32, %c0_i32_0 : i32, i32
  }
  func.func @transform_5(%arg0: i32) -> (i32, i32) {
    %c0_i32 = arith.constant 0 : i32
    %c0_i32_0 = arith.constant 0 : i32
    %c0_i32_1 = arith.constant 0 : i32
    return %c0_i32, %c0_i32_0 : i32, i32
  }
  func.func @transform_6(%arg0: i32) -> (i32, i32) {
    %c0_i32 = arith.constant 0 : i32
    %c0_i32_0 = arith.constant 0 : i32
    %c0_i32_1 = arith.constant 0 : i32
    return %c0_i32, %c0_i32_0 : i32, i32
  }
  func.func @transform_7(%arg0: i32) -> (i32, i32, i32) {
    %c0_i32 = arith.constant 0 : i32
    %c0_i32_0 = arith.constant 0 : i32
    %c0_i32_1 = arith.constant 0 : i32
    %c0_i32_2 = arith.constant 0 : i32
    return %c0_i32, %c0_i32_0, %c0_i32_1 : i32, i32, i32
  }
  func.func @transform_8(%arg0: i32) -> (i32, i32) {
    %c0_i32 = arith.constant 0 : i32
    %c0_i32_0 = arith.constant 0 : i32
    %c0_i32_1 = arith.constant 0 : i32
    return %c0_i32, %c0_i32_0 : i32, i32
  }
  func.func @transform_9(%arg0: i32) -> (i32, i32) {
    %c0_i32 = arith.constant 0 : i32
    %c0_i32_0 = arith.constant 0 : i32
    %c0_i32_1 = arith.constant 0 : i32
    return %c0_i32, %c0_i32_0 : i32, i32
  }
  func.func @transform_10(%arg0: i32) -> (i32, i32) {
    %c0_i32 = arith.constant 0 : i32
    %c0_i32_0 = arith.constant 0 : i32
    %c0_i32_1 = arith.constant 0 : i32
    return %c0_i32, %c0_i32_0 : i32, i32
  }
  func.func @transform_11(%arg0: i32) -> (i32, i32) {
    %c0_i32 = arith.constant 0 : i32
    %c0_i32_0 = arith.constant 0 : i32
    %c0_i32_1 = arith.constant 0 : i32
    return %c0_i32, %c0_i32_0 : i32, i32
  }
  func.func @transform_12(%arg0: i32) -> (i32, i32) {
    %c0_i32 = arith.constant 0 : i32
    %c0_i32_0 = arith.constant 0 : i32
    %c0_i32_1 = arith.constant 0 : i32
    return %c0_i32, %c0_i32_0 : i32, i32
  }
  func.func @transform_13(%arg0: i32) -> (i32, i32) {
    %c0_i32 = arith.constant 0 : i32
    %c0_i32_0 = arith.constant 0 : i32
    %c0_i32_1 = arith.constant 0 : i32
    return %c0_i32, %c0_i32_0 : i32, i32
  }
  func.func @transform_14(%arg0: i32) -> (i32, i32) {
    %c0_i32 = arith.constant 0 : i32
    %c0_i32_0 = arith.constant 0 : i32
    %c0_i32_1 = arith.constant 0 : i32
    return %c0_i32, %c0_i32_0 : i32, i32
  }
  func.func @transform_15(%arg0: i32) -> (i32, i32) {
    %c0_i32 = arith.constant 0 : i32
    %c0_i32_0 = arith.constant 0 : i32
    %c0_i32_1 = arith.constant 0 : i32
    return %c0_i32, %c0_i32_0 : i32, i32
  }
  func.func @transform_16(%arg0: i32) -> (i32, i32) {
    %c0_i32 = arith.constant 0 : i32
    %c0_i32_0 = arith.constant 0 : i32
    %c0_i32_1 = arith.constant 0 : i32
    return %c0_i32, %c0_i32_0 : i32, i32
  }
  func.func @transform_17(%arg0: i32) -> (i32, i32) {
    %c0_i32 = arith.constant 0 : i32
    %c0_i32_0 = arith.constant 0 : i32
    return %arg0, %c0_i32 : i32, i32
  }
  func.func @transform_18(%arg0: i32) -> (i32, i32, i32) {
    %c0_i32 = arith.constant 0 : i32
    %c0_i32_0 = arith.constant 0 : i32
    %c0_i32_1 = arith.constant 0 : i32
    return %arg0, %c0_i32, %c0_i32_0 : i32, i32, i32
  }
}

</mosaic_0001>

<bundles_post_ra>
// kernel: tpu_custom_call.1
= control target key start
LH: loop header
LB: loop body
LE: loop exit
PB: predicated region body
PF: predicated region fallthrough
CT: control target
= control target key end

     0   :  { %s3140_s0 = inlined_call_operand.vmem [shape: f32[2,8,32], index: 0, kind: input, shape index: {}]   ;;  %s3141_s1 = inlined_call_operand.vmem [shape: bf16[32,32], index: 1, kind: input, shape index: {}]   ;;  %s3142_s2 = inlined_call_operand.hbm [shape: f32[1,32], index: 2, kind: input, shape index: {}]   ;;  %s3143_s3 = inlined_call_operand.vmem [shape: bf16[32,32], index: 3, kind: input, shape index: {}]   ;;  %s3144_s4 = inlined_call_operand.hbm [shape: f32[1,32], index: 4, kind: input, shape index: {}]   ;;  %s3145_s5 = inlined_call_operand.vmem [shape: bf16[32,32], index: 5, kind: input, shape index: {}]   ;;  %s3146_s6 = inlined_call_operand.hbm [shape: f32[1,32], index: 6, kind: input, shape index: {}]   ;;  %s3147_s7 = inlined_call_operand.vmem [shape: bf16[4,8,32], index: 7, kind: input, shape index: {}]   ;;  %s3148_s8 = inlined_call_operand.hbm [shape: f32[1,32], index: 8, kind: input, shape index: {}]   ;;  %s3149_s9 = inlined_call_operand.hbm [shape: f32[1,32], index: 9, kind: input, shape index: {}]   ;;  %s3150_s10 = inlined_call_operand.vmem [shape: f32[1,32], index: 10, kind: input, shape index: {}]   ;;  %s3151_s11 = inlined_call_operand.vmem [shape: bf16[32,128], index: 11, kind: input, shape index: {}]   ;;  %s3152_s12 = inlined_call_operand.vmem [shape: f32[1,128], index: 12, kind: input, shape index: {}]   ;;  %s3153_s13 = inlined_call_operand.vmem [shape: bf16[128,32], index: 13, kind: input, shape index: {}]   ;;  %s3154_s14 = inlined_call_operand.vmem [shape: f32[1,32], index: 14, kind: input, shape index: {}]   ;;  %s3155_s15 = inlined_call_operand.vmem [shape: f32[1,32], index: 15, kind: input, shape index: {}]   ;;  %s3156_s16 = inlined_call_operand.vmem [shape: f32[1,32], index: 16, kind: input, shape index: {}]   ;;  %s3157_s17 = inlined_call_operand.hbm [shape: bf16[16,32], index: 17, kind: output, shape index: {0}]   ;;  %s3158_s18 = inlined_call_operand.hbm [shape: f32[2,1,8], index: 18, kind: output, shape index: {1}]  }
   0x1   :  { %3169 = sst [smem:[#allocation25_spill]] %s3140_s0 }
   0x2   :  { %3170 = sst [smem:[#allocation26_spill]] %s3141_s1 }
   0x3   :  { %3171 = sst [smem:[#allocation27_spill]] %s3142_s2 }
   0x4   :  { %3172 = sst [smem:[#allocation28_spill]] %s3143_s3 }
   0x5   :  { %3173 = sst [smem:[#allocation29_spill]] %s3144_s4 }
   0x6   :  { %3174 = sst [smem:[#allocation30_spill]] %s3148_s8 }
   0x7   :  { %24 = vsyncpa [#allocation3], 0 }
   0x8   :  { %25 = vsyncpa [#allocation6], 0 }
   0x9   :  { %26 = vsyncpa [#allocation9], 0 }
   0xa   :  { %27 = vsyncpa [#allocation4], 0 }
   0xb   :  { %29 = vsyncpa [#allocation4 + $0x1], 0 }
   0xc   :  { %30 = vsyncpa [#allocation13], 0 }
   0xd   :  { %32 = vsyncpa [#allocation13 + $0x1], 0  ;;  %s2689_s27 = smov 0   ;;  %s2691_s28 = smov 0  }
   0xe   :  { %s2693_s29 = smov 0   ;;  %s2695_s30 = smov 0  }
   0xf LB: > { %3175 = sst [smem:[#allocation19_spill]] %s2568_s27  ;;  %s2710_s0 = sadd.s32 4294967295, %s2580_s30   ;;  %s2580_s30 = sphi %s2695_s30, %s3205_s30   ;;  %s2576_s29 = sphi %s2693_s29, %s3207_s29   ;;  %s2572_s28 = sphi %s2691_s28, %s3209_s28   ;;  %s2568_s27 = sphi %s2689_s27, %s3208_s27  }
  0x10   : > { %3176 = sst [smem:[#allocation20_spill]] %s2576_s29  ;;  %s1969_s19 = sadd.s32 4294967294, %s2580_s30  }
  0x11   : > { %3177 = sst [smem:[#allocation21_spill]] %s2580_s30  ;;  %s2714_s1 = sadd.s32 1, %s2580_s30  }
  0x12   : > { %3178 = sst [smem:[#allocation22_spill]] %s2714_s1  ;;  %s407_s20 = sadd.s32 1, %s2576_s29 }
  0x13   : > { %s404_s21 = ssub.s32 %s2580_s30, %s2714_s1  ;;  %p417_p0 = scmp.ne.s32.totalorder %s2576_s29, %s2572_s28 }
  0x14   : > { %p405_p1 = scmp.eq.s32.totalorder %s404_s21, 0  ;;  %p418_p2 = scmp.eq.s32.totalorder %s2710_s0, 1 }
  0x15   : > { %p423_p3 = scmp.ne.s32.totalorder %s2572_s28, %s2568_s27  ;;  %p424_p4 = scmp.eq.s32.totalorder %s1969_s19, 1 }
  0x16   : > { %s2725_s22 = scalar_select %p405_p1, %s2576_s29, %s407_s20  }
  0x17   : > { %p2727_p5 = por %p418_p2, %p417_p0  ;;  %p2731_p6 = por %p424_p4, %p423_p3 }
  0x18   : > { %3179 = sst [smem:[#allocation23_spill]] %s2725_s22  ;;  %p1970_p7 = scmp.ge.s32.totalorder %s2580_s30, 1 }
  0x19   : > { %s3180_s2 = scalar_select %p2727_p5, 1, 0 }
  0x1a   : > { %s3181_s23 = scalar_select %p2731_p6, 1, 0 }
  0x1b   : > { %p457_p8 = scmp.lt.s32.totalorder %s2580_s30, 3  ;;  %p3165_p9 = scmp.eq.s32.totalorder %s2710_s0, 0 }
  0x1c   : > { %3182 = sst [smem:[#allocation24_spill]] %s3181_s23  ;;  %s2582_s25 = smov [#allocation5]  }
  0x1d   : > { %p2738_p10 = pnand %p1970_p7, %p457_p8  ;;  %s487_s26 = sshll.u32 %s2582_s25, 4  ;;  %s488_s26 = int_to_ptr.vmem [resolvable:$true] %s487_s26 }
  0x1e   : > { %s2583_s19 = smov [#allocation8]   ;;  %s2584_s22 = smov [#allocation2]  }
  0x1f   : > { %s3183_s24 = scalar_select %p2738_p10, 1, 0 }
  0x20   : > { %p2228_p11 = pneg %p2738_p10  ;;  %s515_s20 = sshll.u32 %s2583_s19, 4  ;;  %s516_s20 = int_to_ptr.vmem [resolvable:$true] %s515_s20 }
  0x21   : > { %s473_s29 = sshll.u32 %s2584_s22, 4  ;;  %s2359_s25 = scalar_lea.vmem %s488_s26, 16  ;;  %s2750_s29 = int_to_ptr.vmem [resolvable:$true] %s473_s29 }
  0x22   : > { %p2746_p12 = pnand %p3165_p9, %p2228_p11  ;;  %p2360_p0 = scmp.ne.s32.totalorder %s488_s26, %s2359_s25 }
  0x23   : > { %s2366_s19 = scalar_lea.vmem %s488_s26, 32  ;;  %p2367_p3 = scmp.lt.s32.totalorder %s488_s26, %s488_s26 }
  0x24   : > { %p2754_p13 = pneg %p2746_p12  ;;  %p2368_p4 = scmp.lt.s32.totalorder %s2366_s19, %s2359_s25 }
  0x26   : > { %p2362_p1 = pnand %p2360_p0, %p2754_p13  ;;  %p2369_p7 = por %p2368_p4, %p2367_p3 }
  0x28   : > { %p2363_p2 = pneg %p2362_p1 }
  0x2a   : > { %p2370_p8 = pnand %p2369_p7, %p2363_p2 }
  0x2c   : > { %2373 = shalt.err (!%p2370_p8)
}
  0x2d   : > { %s3186_s4 = sld [smem:[#allocation29_spill]]  ;;  %s2385_s27 = scalar_lea.vmem %s516_s20, 16 }
  0x2e   : > { %p2386_p11 = scmp.ne.s32.totalorder %s516_s20, %s2385_s27  ;;  %s2392_s30 = scalar_lea.vmem %s516_s20, 32 }
  0x2f   : > { %p2393_p0 = scmp.lt.s32.totalorder %s516_s20, %s516_s20  ;;  %p2394_p1 = scmp.lt.s32.totalorder %s2392_s30, %s2385_s27 }
  0x30   : > { %p2388_p9 = pnand %p2386_p11, %p2754_p13 }
  0x31   : > { %p2395_p5 = por %p2394_p1, %p2393_p0 }
  0x32   : > { %p2389_p6 = pneg %p2388_p9 }
  0x33   : > { %2234 = dma.hbm_to_vmem [thread:$0]  (!%p2746_p12), %s3186_s4, 16, %s488_s26, [#allocation6]  }
  0x34   : > { %p2396_p10 = pnand %p2395_p5, %p2389_p6 }
  0x36   : > { %2399 = shalt.err (!%p2396_p10)
}
  0x37   : > { %s3187_s8 = sld [smem:[#allocation30_spill]]  ;;  %s2411_s23 = scalar_lea.vmem %s2750_s29, 16 }
  0x38   : > { %p2412_p2 = scmp.ne.s32.totalorder %s2750_s29, %s2411_s23  ;;  %s2418_s27 = scalar_lea.vmem %s2750_s29, 32 }
  0x39   : > { %p2419_p5 = scmp.lt.s32.totalorder %s2750_s29, %s2750_s29  ;;  %p2420_p6 = scmp.lt.s32.totalorder %s2418_s27, %s2411_s23 }
  0x3a   : > { %p2414_p9 = pnand %p2412_p2, %p2754_p13 }
  0x3b   : > { %p2421_p10 = por %p2420_p6, %p2419_p5 }
  0x3c   : > { %p2415_p3 = pneg %p2414_p9 }
  0x3d   : > { %2240 = dma.hbm_to_vmem [thread:$0]  (!%p2746_p12), %s3187_s8, 16, %s516_s20, [#allocation9]  }
  0x3e   : > { %p2422_p4 = pnand %p2421_p10, %p2415_p3 }
  0x40   : > { %2425 = shalt.err (!%p2422_p4)
}
  0x41   : > { %s3188_s22 = sld [smem:[#allocation27_spill]]  ;;  %s2585_s20 = smov [#allocation7]  }
  0x42   : > { %s501_s25 = sshll.u32 %s2585_s20, 4  ;;  %s2586_s19 = smov [#allocation10]   ;;  %s502_s25 = int_to_ptr.vmem [resolvable:$true] %s501_s25 }
  0x43   : > { %s526_s4 = sshll.u32 %s2586_s19, 4  ;;  %s2437_s8 = scalar_lea.vmem %s502_s25, 16  ;;  %s527_s4 = int_to_ptr.vmem [resolvable:$true] %s526_s4 }
  0x44   : > { %p2438_p7 = scmp.ne.s32.totalorder %s502_s25, %s2437_s8  ;;  %s2444_s23 = scalar_lea.vmem %s502_s25, 32 }
  0x45   : > { %p2445_p0 = scmp.lt.s32.totalorder %s502_s25, %s502_s25  ;;  %p2446_p1 = scmp.lt.s32.totalorder %s2444_s23, %s2437_s8 }
  0x46   : > { %p2440_p8 = pnand %p2438_p7, %p2754_p13 }
  0x47   : > { %2231 = dma.hbm_to_vmem [thread:$0]  (!%p2746_p12), %s3188_s22, 16, %s2750_s29, [#allocation3]  }
  0x48   : > { %p2441_p11 = pneg %p2440_p8  ;;  %p2447_p2 = por %p2446_p1, %p2445_p0 }
  0x4a   : > { %p2448_p9 = pnand %p2447_p2, %p2441_p11 }
  0x4c   : > { %2451 = shalt.err (!%p2448_p9)
}
  0x4d   : > { %2237 = dma.hbm_to_vmem [thread:$0]  (!%p2746_p12), %s3146_s6, 16, %s502_s25, [#allocation6]  }
  0x4e   : > { %s2463_s30 = scalar_lea.vmem %s527_s4, 16  ;;  %s2470_s26 = scalar_lea.vmem %s527_s4, 32 }
  0x4f   : > { %p2464_p3 = scmp.ne.s32.totalorder %s527_s4, %s2463_s30  ;;  %p2471_p10 = scmp.lt.s32.totalorder %s527_s4, %s527_s4 }
  0x50   : > { %p2472_p4 = scmp.lt.s32.totalorder %s2470_s26, %s2463_s30 }
  0x51   : > { %p2466_p5 = pnand %p2464_p3, %p2754_p13 }
  0x52   : > { %p2473_p7 = por %p2472_p4, %p2471_p10 }
  0x53   : > { %p2467_p6 = pneg %p2466_p5 }
  0x55   : > { %p2474_p8 = pnand %p2473_p7, %p2467_p6 }
  0x57   : > { %2477 = shalt.err (!%p2474_p8)
}
  0x58   : > { %2243 = dma.hbm_to_vmem [thread:$0]  (!%p2746_p12), %s3149_s9, 16, %s527_s4, [#allocation9]  }
  0x59   : > { %p3189_p11 = scmp.ne.s32.totalorder %s3183_s24, 0 }
  0x5a   : > { %p3190_p0 = scmp.eq.s32.totalorder (!%p3189_p11), %s2710_s0, 0 }
  0x5b   : > { %567 = sbr.rel (%p3189_p11) target bundleno = 3164 (0xc5c), region = 88 }
  0x60   : > { %2547 = dma.done.wait (%p3190_p0), [#allocation3], 16   ;;  %p3191_p13 = pmov %p3190_p0 }
  0x61   : > { %p3192_p1 = pmov %p3190_p0 }
  0x62   : > { %2549 = vsyncadd (%p3191_p13), [#allocation3], 4294967280 }
  0x63   : > { %2551 = dma.done.wait (%p3192_p1), [#allocation6], 32   ;;  %p3193_p2 = pmov %p3190_p0 }
  0x64   : > { %p3194_p9 = pmov %p3190_p0 }
  0x65   : > { %2553 = vsyncadd (%p3193_p2), [#allocation6], 4294967264 }
  0x66   : > { %2555 = dma.done.wait (%p3194_p9), [#allocation9], 32   ;;  %p3195_p12 = pmov %p3190_p0 }
  0x67   : > { %p640_p3 = scmp.lt.s32.totalorder %s2710_s0, 1  ;;  %v2587_v0 = vmov 0.0   ;;  %vm2588_vm0 = vmmov 0   ;;  %s3196_s20 = sld [smem:[#allocation25_spill]]  ;;  %vm670_vm1 = vcmask 261120   ;;  %v2308_v7 = vld [vmem:[%s3145_s5 + $0x8] sm:$0xff]  }
  0x68   : > { %2557 = vsyncadd (%p3195_p12), [#allocation9], 4294967264  ;;  %2080 = vmatprep.subr.bf16.mxu1 %v2587_v0  ;;  %2084 = vmatprep.mubr.msk.bf16.mxu1 %vm2588_vm0, %v2587_v0  ;;  %s3197_s27 = sld [smem:[#allocation26_spill]]  ;;  %v2309_v8 = vld [vmem:[%s3145_s5] sm:$0xff]   ;;  %vm844_vm2 = vcmask 64512   ;;  %s2589_s19 = smov 120  }
  0x69   : > { %s641_s4 = scalar_select %p640_p3, %s2710_s0, 1  ;;  %2110 = vmatprep.subr.bf16.mxu0 %v2587_v0  ;;  %2112 = vmatprep.mubr.msk.bf16.mxu0 %vm2588_vm0, %v2587_v0  ;;  %v1985_v11 = vld [vmem:[#allocation2] ss:$0 sm:$0xff]  ;;  %v1989_v14 = vld [vmem:[#allocation5] ss:$0 sm:$0xff]  ;;  %vm908_vm3 = vcmask 1043456  }
  0x6a   : > { %s3199_s3 = sld [smem:[#allocation28_spill]]  ;;  %v1993_v24 = vld [vmem:[#allocation7] ss:$0 sm:$0xff]  ;;  %s2590_s23 = smov 112   ;;  %v959_v58 = vld [vmem:[%s3147_s7] sm:$0xf] }
  0x6b   : > { %s1984_s1 = sshll.u32 %s641_s4, 3  ;;  %v1135_v62 = vsel %vm908_vm3, %v959_v58, 0  ;;  %s2031_s30 = sshll.u32 %s2710_s0, 6  ;;  %vm1799_vm4 = vcmask 257024  }
  0x6c   : > { %s1817_s24 = scalar_lea.hbm %s3157_s17, %s2031_s30  ;;  %p3200_p6 = scmp.ne.s32.totalorder %s3180_s2, 0 }
  0x6d   : > { %s643_s25 = scalar_lea.vmem %s3196_s20, %s1984_s1  ;;  %s3073_s20 = sand.u32 1, %s2572_s28  }
  0x6e   : > { %s3198_s26 = smov %s3197_s27  ;;  %v2304_v1 = vld [vmem:[%s3197_s27 + $0x8] sm:$0xff]   ;;  %v2830_v3 = vld [vmem:[%s643_s25] sm:$0xff]  ;;  %s2591_s27 = smov 104  }
  0x6f   : > { %v2305_v2 = vld [vmem:[%s3198_s26] sm:$0xff]   ;;  %2081 = vmatpush3.bf16.msra.mxu1 %v2304_v1  ;;  %v646_v4 = vpack.c.bf16 %v2830_v3, %v2830_v3  ;;  %s1983_s25 = sshll.u32 %s3073_s20, 2  ;;  %s1802_s21 = scalar_lea.sflag [#allocation4], %s3073_s20 }
  0x70   : > { %2082 = vmatprep.subr.bf16.mxu1 %v2587_v0  ;;  %v2306_v5 = vld [vmem:[%s3199_s3 + $0x8] sm:$0xff]   ;;  %v2307_v6 = vld [vmem:[%s3199_s3] sm:$0xff]   ;;  %s633_s8 = scalar_lea.vmem [#allocation11], %s1983_s25 }
  0x71   : > { %v2001_v1 = vld [vmem:[%s3147_s7 + $0x4] sm:$0xf]  ;;  %s1819_s22 = sshll.u32 %s633_s8, 4  ;;  %s1820_s22 = int_to_ptr.vmem [resolvable:$true] %s1819_s22 }
  0x73   : > { %2083 = vmatpush3.bf16.msra.mxu1 %v2305_v2  ;;  %v1089_v2 = vsel %vm908_vm3, %v2001_v1, 0 }
  0x74   : > { %2088 = vmatprep.subr.bf16.mxu1 %v2587_v0 }
  0x76   : > { %2085 = vmatmul.mubr.msk.bf16.vlgmr.msra.gmra.mxu1 %vm670_vm1, %v646_v4 }
  0x77   : > { %2089 = vmatpush3.bf16.msra.mxu1 %v2306_v5  ;;  %2092 = vmatprep.mubr.msk.bf16.mxu1 %vm2588_vm0, %v2587_v0 }
  0x78   : > { %2090 = vmatprep.subr.bf16.mxu1 %v2587_v0 }
  0x7b   : > { %2091 = vmatpush3.bf16.msra.mxu1 %v2307_v6 }
  0x7c   : > { %2096 = vmatprep.subr.bf16.mxu1 %v2587_v0 }
  0x7e   : > { %2093 = vmatmul.mubr.msk.bf16.vlgmr.msra.gmra.mxu1 %vm670_vm1, %v646_v4 }
  0x7f   : > { %2097 = vmatpush3.bf16.msra.mxu1 %v2308_v7  ;;  %2100 = vmatprep.mubr.msk.bf16.mxu1 %vm2588_vm0, %v2587_v0 }
  0x80   : > { %2098 = vmatprep.subr.bf16.mxu1 %v2587_v0 }
  0x83   : > { %2099 = vmatpush3.bf16.msra.mxu1 %v2309_v8 }
  0x84   : > { %2104 = vmatprep.subr.bf16.mxu1 %v2587_v0 }
  0x86   : > { %2101 = vmatmul.mubr.msk.bf16.vlgmr.msra.gmra.mxu1 %vm670_vm1, %v646_v4 }
  0x87   : > { %2106 = vmatprep.mubr.msk.bf16.mxu1 %vm2588_vm0, %v2587_v0 }
 0x136   : > { %v708_v9 = vpop.f32.mrf.mxu1 }
 0x137   : > { %v709_v15 = vadd.f32 %v1985_v11, %v708_v9 }
 0x138   : > { %v2086_v10 = vpop.f32.mrf.mxu1 }
 0x139   : > { %v840_v19 = vmul.f32 0.35355338, %v709_v15 }
 0x13a   : > { %v711_v12 = vpop.f32.mrf.mxu1 }
 0x13b   : > { %v2866_v25 = vpack.c.bf16 %v840_v19, %v840_v19 }
 0x13c   : > { %v2087_v13 = vpop.f32.mrf.mxu1 }
 0x13e   : > { %v771_v16 = vpop.f32.mrf.mxu1 }
 0x13f   : > { %v772_v17 = vadd.f32 %v1989_v14, %v771_v16 }
 0x140   : > { %v2094_v18 = vpop.f32.mrf.mxu1 }
 0x141   : > { %v2861_v20 = vpack.c.bf16 %v772_v17, %v772_v17 }
 0x142   : > { %v774_v21 = vpop.f32.mrf.mxu1 }
 0x143   : > { %964 = vrot.lane.b32.xlu0 %v2861_v20, %s2589_s19  ;;  %v849_v22 = vsel %vm844_vm2, %v2861_v20, 0 }
 0x144   : > { %v2095_v23 = vpop.f32.mrf.mxu1  ;;  %2105 = vmatpush3.bf16.xpose.msra.mxu1 %v849_v22 }
 0x145   : > { %2116 = vmatprep.subr.bf16.mxu1 %v2587_v0 }
 0x146   : > { %v834_v26 = vpop.f32.mrf.mxu1 }
 0x147   : > { %v835_v27 = vadd.f32 %v1993_v24, %v834_v26  ;;  %961 = vrot.lane.b32.xlu0 %v2866_v25, %s2589_s19 }
 0x148   : > { %v2102_v28 = vpop.f32.mrf.mxu1 }
 0x149   : > { %v2870_v29 = vpack.c.bf16 %v835_v27, %v835_v27 }
 0x14a   : > { %v837_v30 = vpop.f32.mrf.mxu1 }
 0x14b   : > { %2107 = vmatmul.mubr.msk.bf16.vlgmr.msra.gmra.mxu1 %vm844_vm2, %v2866_v25  ;;  %1027 = vrot.lane.b32.xlu0 %v2870_v29, %s2589_s19  ;;  %v910_v32 = vsel %vm908_vm3, %v2870_v29, 0  ;;  %s2478_s19 = scalar_lea.vmem %s1820_s22, 64 }
 0x14c   : > { %2118 = vmatprep.mubr.msk.bf16.mxu1 %vm2588_vm0, %v2587_v0  ;;  %v2103_v31 = vpop.f32.mrf.mxu1  ;;  %2111 = vmatpush3.bf16.msra.mxu0 %v910_v32  ;;  %p2479_p5 = scmp.ne.s32.totalorder %s1820_s22, %s2478_s19 }
 0x14d   : > { %2122 = vmatprep.subr.bf16.mxu0 %v2587_v0 }
 0x14e   : > { %p2480_p10 = pnand %p2479_p5, %p3200_p6 }
 0x14f   : > { %1179 = vrot.lane.b32.xlu0 %v2861_v20, %s2590_s23 }
 0x150   : > { %p2481_p4 = pneg %p2480_p10 }
 0x1b5   : > { %v965_v33 = vpop.permute.xlu0 %964 }
 0x1b6   : > { %v970_v34 = vsel %vm844_vm2, %v965_v33, 0 }
 0x1b7   : > { %2117 = vmatpush3.bf16.xpose.msra.mxu1 %v970_v34 }
 0x1b8   : > { %2128 = vmatprep.subr.bf16.mxu1 %v2587_v0 }
 0x1b9   : > { %v962_v35 = vpop.permute.xlu0 %961 }
 0x1bd   : > { %v1028_v50 = vpop.permute.xlu0 %1027 }
 0x1be   : > { %2119 = vmatmul.mubr.msk.bf16.vlgmr.msra.gmra.mxu1 %vm844_vm2, %v962_v35  ;;  %v1033_v51 = vsel %vm908_vm3, %v1028_v50, 0 }
 0x1bf   : > { %2130 = vmatprep.mubr.msk.bf16.mxu1 %vm2588_vm0, %v2587_v0  ;;  %2129 = vmatpush3.bf16.msra.mxu1 %v1089_v2 }
 0x1c0   : > { %2140 = vmatprep.subr.bf16.mxu1 %v2587_v0 }
 0x1c1   : > { %v1180_v4 = vpop.permute.xlu0 %1179 }
 0x1c2   : > { %v1185_v23 = vsel %vm844_vm2, %v1180_v4, 0 }
 0x20b   : > { %v885_v36 = vpop.f32.mrf.mxu1 }
 0x20c   : > { %v891_v37 = vsel %vm844_vm2, %v885_v36, -inf }
 0x20d   : > { %892 = vmax.xlane.f32.xlu1 %v891_v37  ;;  %v2108_v38 = vpop.f32.mrf.mxu1 }
 0x20f   : > { %v888_v39 = vpop.f32.mrf.mxu1 }
 0x211   : > { %v2109_v40 = vpop.f32.mrf.mxu1 }
 0x27e   : > { %v1006_v41 = vpop.f32.mrf.mxu1 }
 0x27f   : > { %v1012_v42 = vsel %vm844_vm2, %v1006_v41, -inf }
 0x280   : > { %1013 = vmax.xlane.f32.xlu1 %v1012_v42  ;;  %v2120_v43 = vpop.f32.mrf.mxu1 }
 0x282   : > { %v1009_v44 = vpop.f32.mrf.mxu1 }
 0x284   : > { %v2121_v45 = vpop.f32.mrf.mxu1 }
 0x296   : > { %v893_v46 = vpop.xlane.xlu1 %892 }
 0x297   : > { %v894_v47 = vsub.f32 %v885_v36, %v893_v46 }
 0x299   : > { %v895_v48 = vmul.f32 1.442695, %v894_v47 }
 0x29b   : > { %2320 = vpow2.f32 %v895_v48 }
 0x2a8   : > { %v2321_v49 = vpop.eup %2320 }
 0x2a9   : > { %v897_v52 = vsel %vm844_vm2, %v2321_v49, 0.0  ;;  %v904_v53 = vpack.c.bf16 %v2321_v49, %v2321_v49  ;;  %v2891_v54 = vmul.f32 %v2321_v49, %v894_v47  ;;  %v2006_v49 = vld [vmem:[%s3147_s7 + $0x8] sm:$0xf] }
 0x2aa   : > { %898 = vadd.xlane.f32.xlu0 %v897_v52  ;;  %v1303_v50 = vsel %vm908_vm3, %v2006_v49, 0  ;;  %v2312_v49 = vld [vmem:[%s3153_s13 + $0x38] sm:$0xff]  }
 0x2ab   : > { %2113 = vmatmul.mubr.msk.bf16.vlgmr.msra.gmra.mxu0 %vm844_vm2, %v904_v53 }
 0x2ac   : > { %2123 = vmatpush3.bf16.msra.mxu0 %v1033_v51  ;;  %2124 = vmatprep.mubr.msk.bf16.mxu0 %vm2588_vm0, %v2587_v0 }
 0x2ad   : > { %2134 = vmatprep.subr.bf16.mxu0 %v2587_v0 }
 0x2c0   : > { %1241 = vrot.lane.b32.xlu0 %v2870_v29, %s2590_s23 }
 0x2c4   : > { %1346 = vrot.lane.b32.xlu0 %v2866_v25, %s2591_s27 }
 0x309   : > { %v1014_v55 = vpop.xlane.xlu1 %1013 }
 0x30a   : > { %v1015_v56 = vsub.f32 %v1006_v41, %v1014_v55 }
 0x30c   : > { %v1016_v57 = vmul.f32 1.442695, %v1015_v56 }
 0x30e   : > { %2322 = vpow2.f32 %v1016_v57 }
 0x31b   : > { %v2323_v59 = vpop.eup %2322 }
 0x31c   : > { %v1018_v60 = vsel %vm844_vm2, %v2323_v59, 0.0  ;;  %v1025_v61 = vpack.c.bf16 %v2323_v59, %v2323_v59  ;;  %v2906_v63 = vmul.f32 %v2323_v59, %v1015_v56 }
 0x31d   : > { %1019 = vadd.xlane.f32.xlu1 %v1018_v60 }
 0x31e   : > { %2125 = vmatmul.mubr.msk.bf16.vlgmr.msra.gmra.mxu0 %vm844_vm2, %v1025_v61 }
 0x31f   : > { %2135 = vmatpush3.bf16.msra.mxu0 %v1135_v62  ;;  %2136 = vmatprep.mubr.msk.bf16.mxu0 %vm2588_vm0, %v2587_v0 }
 0x320   : > { %2146 = vmatprep.subr.bf16.mxu0 %v2587_v0 }
 0x32e   : > { %1177 = vrot.lane.b32.xlu1 %v2866_v25, %s2590_s23  ;;  %s2592_s23 = smov [#allocation11]  }
 0x333   : > { %v2919_v5 = vpop.xlane.xlu0 %898 }
 0x334   : > { %2324 = vrcp.f32 %v2919_v5 }
 0x337   : > { %v1242_v9 = vpop.permute.xlu0 %1241 }
 0x338   : > { %v1247_v13 = vsel %vm908_vm3, %v1242_v9, 0 }
 0x341   : > { %v2922_v6 = vpop.eup %2324 }
 0x36b   : > { %v946_v7 = vpop.f32.mrf.mxu0 }
 0x36c   : > { %v957_v8 = vmul.f32 %v2922_v6, %v946_v7 }
 0x36d   : > { %v2114_v10 = vpop.f32.mrf.mxu0 }
 0x36e   : > { %v958_v11 = vpack.c.bf16 %v957_v8, %v957_v8 }
 0x36f   : > { %v949_v12 = vpop.f32.mrf.mxu0 }
 0x370   : > { %2137 = vmatmul.mubr.msk.bf16.vlgmr.msra.gmra.mxu0 %vm844_vm2, %v958_v11 }
 0x371   : > { %2147 = vmatpush3.bf16.msra.mxu0 %v1247_v13  ;;  %v2115_v14 = vpop.f32.mrf.mxu0  ;;  %2148 = vmatprep.mubr.msk.bf16.mxu0 %vm2588_vm0, %v2587_v0 }
 0x372   : > { %2158 = vmatprep.subr.bf16.mxu0 %v2587_v0  ;;  %v2010_v14 = vld [vmem:[%s3147_s7 + $0xc] sm:$0xf] }
 0x3a6   : > { %v2930_v15 = vpop.xlane.xlu1 %1019 }
 0x3a7   : > { %2326 = vrcp.f32 %v2930_v15 }
 0x3aa   : > { %v1178_v25 = vpop.permute.xlu1 %1177 }
 0x3b4   : > { %v2933_v16 = vpop.eup %2326 }
 0x3de   : > { %v1069_v17 = vpop.f32.mrf.mxu0 }
 0x3df   : > { %v1081_v18 = vmul.f32 %v2933_v16, %v1069_v17  ;;  %v1472_v17 = vsel %vm908_vm3, %v2010_v14, 0 }
 0x3e0   : > { %v2126_v19 = vpop.f32.mrf.mxu0 }
 0x3e1   : > { %v1082_v21 = vpack.c.bf16 %v1081_v18, %v1081_v18 }
 0x3e2   : > { %v1072_v22 = vpop.f32.mrf.mxu0 }
 0x3e3   : > { %2131 = vmatmul.mubr.msk.bf16.vlgmr.msra.gmra.mxu1 %vm844_vm2, %v1082_v21 }
 0x3e4   : > { %2141 = vmatpush3.bf16.xpose.msra.mxu1 %v1185_v23  ;;  %v2127_v24 = vpop.f32.mrf.mxu0  ;;  %2142 = vmatprep.mubr.msk.bf16.mxu1 %vm2588_vm0, %v2587_v0 }
 0x3e5   : > { %2152 = vmatprep.subr.bf16.mxu1 %v2587_v0 }
 0x3eb   : > { %2143 = vmatmul.mubr.msk.bf16.vlgmr.msra.gmra.mxu1 %vm844_vm2, %v1178_v25 }
 0x3ec   : > { %2154 = vmatprep.mubr.msk.bf16.mxu1 %vm2588_vm0, %v2587_v0  ;;  %2153 = vmatpush3.bf16.msra.mxu1 %v1303_v50  ;;  %v2313_v50 = vld [vmem:[%s3153_s13 + $0x30] sm:$0xff]  }
 0x3ed   : > { %2164 = vmatprep.subr.bf16.mxu1 %v2587_v0 }
 0x430   : > { %v2944_v26 = vpop.f32.mrf.mxu0 }
 0x432   : > { %v2138_v27 = vpop.f32.mrf.mxu0 }
 0x434   : > { %v1174_v28 = vpop.f32.mrf.mxu0 }
 0x436   : > { %v2139_v30 = vpop.f32.mrf.mxu0 }
 0x4a3   : > { %v2946_v31 = vpop.f32.mrf.mxu1 }
 0x4a4   : > { %v1172_v18 = vadd.f32 %v2944_v26, %v2946_v31 }
 0x4a5   : > { %v2132_v32 = vpop.f32.mrf.mxu1 }
 0x4a7   : > { %v1128_v33 = vpop.f32.mrf.mxu1 }
 0x4a9   : > { %v2133_v34 = vpop.f32.mrf.mxu1 }
 0x4ab   : > { %v1221_v35 = vpop.f32.mrf.mxu1 }
 0x4ac   : > { %v1227_v36 = vsel %vm844_vm2, %v1221_v35, -inf }
 0x4ad   : > { %1228 = vmax.xlane.f32.xlu1 %v1227_v36  ;;  %v2144_v37 = vpop.f32.mrf.mxu1 }
 0x4af   : > { %v1224_v38 = vpop.f32.mrf.mxu1 }
 0x4b1   : > { %v2145_v39 = vpop.f32.mrf.mxu1 }
 0x4be   : > { %1348 = vrot.lane.b32.xlu1 %v2861_v20, %s2591_s27  ;;  %v1347_v20 = vpop.permute.xlu0 %1346 }
 0x536   : > { %v1229_v40 = vpop.xlane.xlu1 %1228 }
 0x537   : > { %v1230_v41 = vsub.f32 %v1221_v35, %v1229_v40  ;;  %v2012_v35 = vld [vmem:[#allocation8] ss:$0 sm:$0xff] }
 0x539   : > { %v1231_v42 = vmul.f32 1.442695, %v1230_v41 }
 0x53a   : > { %v1349_v44 = vpop.permute.xlu1 %1348 }
 0x53b   : > { %2328 = vpow2.f32 %v1231_v42  ;;  %v1354_v48 = vsel %vm844_vm2, %v1349_v44, 0 }
 0x548   : > { %v2329_v43 = vpop.eup %2328 }
 0x549   : > { %v1233_v45 = vsel %vm844_vm2, %v2329_v43, 0.0  ;;  %v1240_v46 = vpack.c.bf16 %v2329_v43, %v2329_v43  ;;  %v2952_v47 = vmul.f32 %v2329_v43, %v1230_v41 }
 0x54a   : > { %1234 = vadd.xlane.f32.xlu0 %v1233_v45 }
 0x54b   : > { %2149 = vmatmul.mubr.msk.bf16.vlgmr.msra.gmra.mxu0 %vm844_vm2, %v1240_v46 }
 0x54c   : > { %2159 = vmatpush3.bf16.xpose.msra.mxu0 %v1354_v48  ;;  %2160 = vmatprep.mubr.msk.bf16.mxu0 %vm2588_vm0, %v2587_v0 }
 0x54d   : > { %2170 = vmatprep.subr.bf16.mxu0 %v2587_v0 }
 0x553   : > { %2161 = vmatmul.mubr.msk.bf16.vlgmr.msra.gmra.mxu0 %vm844_vm2, %v1347_v20  ;;  %v2310_v20 = vld [vmem:[%s3151_s11 + $0x8] sm:$0xff]  }
 0x554   : > { %2172 = vmatprep.mubr.msk.bf16.mxu0 %vm2588_vm0, %v2587_v0  ;;  %2171 = vmatpush3.bf16.msra.mxu0 %v1472_v17 }
 0x555   : > { %2184 = vmatprep.subr.bf16.mxu0 %v2587_v0 }
 0x560   : > { %1410 = vrot.lane.b32.xlu0 %v2870_v29, %s2591_s27  ;;  %s2482_s27 = sshll.u32 %s2592_s23, 4  ;;  %s2483_s27 = int_to_ptr.vmem [resolvable:$false] %s2482_s27 }
 0x561   : > { %s2484_s25 = scalar_lea.vmem %s2483_s27, 128  ;;  %p2485_p7 = scmp.lt.s32.totalorder %s1820_s22, %s2483_s27 }
 0x562   : > { %p2486_p8 = scmp.lt.s32.totalorder %s2484_s25, %s2478_s19 }
 0x564   : > { %p2487_p11 = por %p2486_p8, %p2485_p7 }
 0x566   : > { %p2488_p0 = pnand %p2487_p11, %p2481_p4 }
 0x5d3   : > { %v2969_v51 = vpop.xlane.xlu0 %1234 }
 0x5d4   : > { %2330 = vrcp.f32 %v2969_v51 }
 0x5d7   : > { %v1411_v56 = vpop.permute.xlu0 %1410 }
 0x5d8   : > { %v1416_v59 = vsel %vm908_vm3, %v1411_v56, 0  ;;  %v2316_v56 = vld [vmem:[%s3153_s13 + $0x18] sm:$0xff]  }
 0x5e1   : > { %v2972_v52 = vpop.eup %2330 }
 0x60b   : > { %v1283_v53 = vpop.f32.mrf.mxu0 }
 0x60c   : > { %v1295_v55 = vmul.f32 %v2972_v52, %v1283_v53  ;;  %v2314_v53 = vld [vmem:[%s3153_s13 + $0x28] sm:$0xff]  }
 0x60d   : > { %v2150_v29 = vpop.f32.mrf.mxu0 }
 0x60e   : > { %v1296_v57 = vpack.c.bf16 %v1295_v55, %v1295_v55  ;;  %v2315_v55 = vld [vmem:[%s3153_s13 + $0x20] sm:$0xff]   ;;  %v2317_v29 = vld [vmem:[%s3153_s13 + $0x10] sm:$0xff]  }
 0x60f   : > { %v1286_v58 = vpop.f32.mrf.mxu0 }
 0x610   : > { %2155 = vmatmul.mubr.msk.bf16.vlgmr.msra.gmra.mxu1 %vm844_vm2, %v1296_v57 }
 0x611   : > { %2165 = vmatpush3.bf16.msra.mxu1 %v1416_v59  ;;  %v2151_v60 = vpop.f32.mrf.mxu0  ;;  %2166 = vmatprep.mubr.msk.bf16.mxu1 %vm2588_vm0, %v2587_v0 }
 0x612   : > { %2176 = vmatprep.subr.bf16.mxu1 %v2587_v0 }
 0x613   : > { %v1390_v61 = vpop.f32.mrf.mxu0 }
 0x614   : > { %v1396_v62 = vsel %vm844_vm2, %v1390_v61, -inf }
 0x615   : > { %1397 = vmax.xlane.f32.xlu1 %v1396_v62  ;;  %v2162_v1 = vpop.f32.mrf.mxu0 }
 0x616   : > { %v2014_v1 = vld [vmem:[%s3150_s10] ss:$0 sm:$0xff] }
 0x617   : > { %v1393_v2 = vpop.f32.mrf.mxu0 }
 0x619   : > { %v2163_v4 = vpop.f32.mrf.mxu0 }
 0x69e   : > { %v1398_v7 = vpop.xlane.xlu1 %1397 }
 0x69f   : > { %v1399_v8 = vsub.f32 %v1390_v61, %v1398_v7  ;;  %v2013_v61 = vld [vmem:[#allocation10] ss:$0 sm:$0xff] }
 0x6a1   : > { %v1400_v9 = vmul.f32 1.442695, %v1399_v8 }
 0x6a3   : > { %2332 = vpow2.f32 %v1400_v9  ;;  %v2319_v9 = vld [vmem:[%s3153_s13] sm:$0xff]  }
 0x6b0   : > { %v2333_v10 = vpop.eup %2332 }
 0x6b1   : > { %v1402_v11 = vsel %vm844_vm2, %v2333_v10, 0.0  ;;  %v1409_v12 = vpack.c.bf16 %v2333_v10, %v2333_v10  ;;  %v2982_v13 = vmul.f32 %v2333_v10, %v1399_v8  ;;  %v2318_v8 = vld [vmem:[%s3153_s13 + $0x8] sm:$0xff]   ;;  %v2015_v10 = vld [vmem:[%s3152_s12] ss:$0 sm:$0xff] }
 0x6b2   : > { %1403 = vadd.xlane.f32.xlu1 %v1402_v11 }
 0x6b3   : > { %2167 = vmatmul.mubr.msk.bf16.vlgmr.msra.gmra.mxu1 %vm844_vm2, %v1409_v12 }
 0x6b4   : > { %2180 = vmatprep.mubr.msk.bf16.mxu1 %vm2588_vm0, %v2587_v0  ;;  %2177 = vmatpush3.bf16.msra.mxu1 %v2310_v20 }
 0x6b5   : > { %2178 = vmatprep.subr.bf16.mxu1 %v2587_v0 }
 0x6d0   : > { %v1339_v19 = vpop.f32.mrf.mxu1 }
 0x6d1   : > { %v1345_v21 = vadd.f32 %v1339_v19, %v1172_v18 }
 0x6d2   : > { %v2156_v22 = vpop.f32.mrf.mxu1 }
 0x6d4   : > { %v1342_v23 = vpop.f32.mrf.mxu1 }
 0x6d6   : > { %v2157_v24 = vpop.f32.mrf.mxu1 }
 0x73b   : > { %v2994_v25 = vpop.xlane.xlu1 %1403 }
 0x73c   : > { %2334 = vrcp.f32 %v2994_v25 }
 0x749   : > { %v2997_v27 = vpop.eup %2334 }
 0x773   : > { %v1452_v28 = vpop.f32.mrf.mxu1 }
 0x774   : > { %v1464_v30 = vmul.f32 %v2997_v27, %v1452_v28 }
 0x775   : > { %v2168_v32 = vpop.f32.mrf.mxu1 }
 0x776   : > { %v1465_v33 = vpack.c.bf16 %v1464_v30, %v1464_v30 }
 0x777   : > { %v1455_v34 = vpop.f32.mrf.mxu1 }
 0x778   : > { %2173 = vmatmul.mubr.msk.bf16.vlgmr.msra.gmra.mxu0 %vm844_vm2, %v1465_v33  ;;  %v901_v34 = vsel %vm844_vm2, %v2891_v54, 0.0 }
 0x779   : > { %v2169_v26 = vpop.f32.mrf.mxu1  ;;  %2200 = vmatprep.mubr.msk.bf16.mxu0 %vm2588_vm0, %v2587_v0  ;;  %2185 = vmatpush3.bf16.msra.mxu0 %v2312_v49 }
 0x77a   : > { %2186 = vmatprep.subr.bf16.mxu0 %v2587_v0  ;;  %v1022_v26 = vsel %vm844_vm2, %v2906_v63, 0.0 }
 0x77d   : > { %2187 = vmatpush3.bf16.msra.mxu0 %v2313_v50 }
 0x77e   : > { %2188 = vmatprep.subr.bf16.mxu0 %v2587_v0 }
 0x781   : > { %2189 = vmatpush3.bf16.msra.mxu0 %v2314_v53 }
 0x782   : > { %2190 = vmatprep.subr.bf16.mxu0 %v2587_v0 }
 0x785   : > { %2191 = vmatpush3.bf16.msra.mxu0 %v2315_v55 }
 0x786   : > { %2192 = vmatprep.subr.bf16.mxu0 %v2587_v0 }
 0x789   : > { %2193 = vmatpush3.bf16.msra.mxu0 %v2316_v56 }
 0x78a   : > { %2194 = vmatprep.subr.bf16.mxu0 %v2587_v0 }
 0x78d   : > { %2195 = vmatpush3.bf16.msra.mxu0 %v2317_v29 }
 0x78e   : > { %2196 = vmatprep.subr.bf16.mxu0 %v2587_v0 }
 0x791   : > { %2197 = vmatpush3.bf16.msra.mxu0 %v2318_v8 }
 0x792   : > { %2198 = vmatprep.subr.bf16.mxu0 %v2587_v0  ;;  %v2019_v0 = vld [vmem:[%s3154_s14] ss:$0 sm:$0xff] }
 0x795   : > { %2199 = vmatpush3.bf16.msra.mxu0 %v2319_v9 }
 0x838   : > { %v1508_v31 = vpop.f32.mrf.mxu0 }
 0x839   : > { %v1514_v36 = vadd.f32 %v1508_v31, %v1345_v21  ;;  %v1237_v31 = vsel %vm844_vm2, %v2952_v47, 0.0 }
 0x83a   : > { %v2174_v37 = vpop.f32.mrf.mxu0 }
 0x83b   : > { %v1522_v38 = vadd.f32 %v2012_v35, %v1514_v36  ;;  %v1406_v35 = vsel %vm844_vm2, %v2982_v13, 0.0 }
 0x83c   : > { %v1511_v39 = vpop.f32.mrf.mxu0 }
 0x83d   : > { %v1557_v40 = vadd.f32 %v1522_v38, %v2830_v3  ;;  %v2311_v3 = vld [vmem:[%s3151_s11] sm:$0xff]  }
 0x83e   : > { %v2175_v41 = vpop.f32.mrf.mxu0  ;;  %2179 = vmatpush3.bf16.msra.mxu1 %v2311_v3 }
 0x83f   : > { %v1560_v42 = vsel %vm670_vm1, %v1557_v40, 0.0 }
 0x840   : > { %1561 = vadd.xlane.f32.xlu1 %v1560_v42 }
 0x8c9   : > { %v1562_v43 = vpop.xlane.xlu1 %1561 }
 0x8ca   : > { %v1564_v44 = vmul.f32 0.03125, %v1562_v43 }
 0x8cc   : > { %v1565_v45 = vsub.f32 %v1557_v40, %v1564_v44 }
 0x8ce   : > { %v1566_v46 = vmul.f32 %v1565_v45, %v1565_v45 }
 0x8d0   : > { %v1567_v48 = vsel %vm670_vm1, %v1566_v46, 0.0 }
 0x8d1   : > { %1568 = vadd.xlane.f32.xlu0 %v1567_v48 }
 0x95a   : > { %v1569_v57 = vpop.xlane.xlu0 %1568 }
 0x95b   : > { %v1570_v58 = vmul.f32 0.03125, %v1569_v57 }
 0x95d   : > { %v1571_v59 = vadd.f32 1e-05, %v1570_v58 }
 0x95f   : > { %2336 = vrsqrt.f32 %v1571_v59  ;;  %v2029_v59 = vld [vmem:[%s3156_s16] ss:$0 sm:$0xff] }
 0x960   : > { %2338 = vlog2.f32 %v2919_v5 }
 0x961   : > { %2340 = vlog2.f32 %v2930_v15 }
 0x962   : > { %2342 = vlog2.f32 %v2969_v51 }
 0x963   : > { %2344 = vlog2.f32 %v2994_v25  ;;  %v2028_v25 = vld [vmem:[%s3155_s15] ss:$0 sm:$0xff] }
 0x96c   : > { %v2337_v60 = vpop.eup %2336 }
 0x96d   : > { %v1573_v62 = vmul.f32 %v2337_v60, %v1565_v45  ;;  %v2339_v63 = vpop.eup %2338 }
 0x96e   : > { %v2341_v40 = vpop.eup %2340  ;;  %v954_v42 = vmul.f32 0.6931472, %v2339_v63 }
 0x96f   : > { %v1580_v2 = vmul.f32 %v2013_v61, %v1573_v62  ;;  %v1077_v43 = vmul.f32 0.6931472, %v2341_v40  ;;  %v2343_v15 = vpop.eup %2342 }
 0x970   : > { %v1291_v48 = vmul.f32 0.6931472, %v2343_v15  ;;  %v2345_v50 = vpop.eup %2344 }
 0x971   : > { %v1587_v4 = vadd.f32 %v2014_v1, %v1580_v2  ;;  %v1460_v55 = vmul.f32 0.6931472, %v2345_v50 }
 0x973   : > { %v1588_v7 = vpack.c.bf16 %v1587_v4, %v1587_v4 }
 0x975   : > { %2181 = vmatmul.mubr.msk.bf16.vlgmr.msra.gmra.mxu1 %vm670_vm1, %v1588_v7 }
 0xa35   : > { %v1649_v11 = vpop.f32.mrf.mxu1 }
 0xa36   : > { %v1650_v12 = vadd.f32 %v2015_v10, %v1649_v11 }
 0xa37   : > { %v2182_v14 = vpop.f32.mrf.mxu1 }
 0xa38   : > { %v1655_v17 = vmax.f32 %v1650_v12, 0.0 }
 0xa39   : > { %v1652_v18 = vpop.f32.mrf.mxu1 }
 0xa3a   : > { %v1656_v19 = vpack.c.bf16 %v1655_v17, %v1655_v17 }
 0xa3b   : > { %v2183_v21 = vpop.f32.mrf.mxu1 }
 0xa3c   : > { %2201 = vmatmul.mubr.bf16.vlgmr.msra.gmra.mxu0 %v1656_v19 }
 0xafc   : > { %v1762_v22 = vpop.f32.mrf.mxu0 }
 0xafd   : > { %v1763_v23 = vadd.f32 %v2019_v0, %v1762_v22 }
 0xafe   : > { %v2202_v24 = vpop.f32.mrf.mxu0 }
 0xaff   : > { %v1768_v28 = vadd.f32 %v1763_v23, %v1587_v4 }
 0xb00   : > { %v1765_v30 = vpop.f32.mrf.mxu0 }
 0xb01   : > { %v1771_v32 = vsel %vm670_vm1, %v1768_v28, 0.0 }
 0xb02   : > { %1772 = vadd.xlane.f32.xlu1 %v1771_v32  ;;  %v2203_v33 = vpop.f32.mrf.mxu0 }
 0xb06   : > { %902 = vadd.xlane.f32.xlu1 %v901_v34 }
 0xb0a   : > { %1023 = vadd.xlane.f32.xlu1 %v1022_v26 }
 0xb0e   : > { %1238 = vadd.xlane.f32.xlu1 %v1237_v31 }
 0xb12   : > { %1407 = vadd.xlane.f32.xlu1 %v1406_v35 }
 0xb8b   : > { %v1773_v54 = vpop.xlane.xlu1 %1772 }
 0xb8c   : > { %v1774_v36 = vmul.f32 0.03125, %v1773_v54 }
 0xb8e   : > { %v1775_v37 = vsub.f32 %v1768_v28, %v1774_v36 }
 0xb8f   : > { %v903_v38 = vpop.xlane.xlu1 %902 }
 0xb90   : > { %v1776_v39 = vmul.f32 %v1775_v37, %v1775_v37  ;;  %v955_v47 = vmul.f32 %v2922_v6, %v903_v38 }
 0xb92   : > { %v1777_v41 = vsel %vm670_vm1, %v1776_v39, 0.0  ;;  %v956_v44 = vsub.f32 %v954_v42, %v955_v47 }
 0xb93   : > { %1778 = vadd.xlane.f32.xlu1 %v1777_v41  ;;  %v1024_v13 = vpop.xlane.xlu1 %1023 }
 0xb94   : > { %v1078_v5 = vmul.f32 %v2933_v16, %v1024_v13 }
 0xb96   : > { %v1079_v51 = vsub.f32 %v1077_v43, %v1078_v5 }
 0xb97   : > { %v1239_v45 = vpop.xlane.xlu1 %1238 }
 0xb98   : > { %v1080_v46 = vmax.f32 %v956_v44, %v1079_v51  ;;  %v1292_v20 = vmul.f32 %v2972_v52, %v1239_v45 }
 0xb9a   : > { %v1293_v3 = vsub.f32 %v1291_v48, %v1292_v20 }
 0xb9b   : > { %v1408_v6 = vpop.xlane.xlu1 %1407 }
 0xb9c   : > { %v1294_v49 = vmax.f32 %v1080_v46, %v1293_v3  ;;  %v1461_v53 = vmul.f32 %v2997_v27, %v1408_v6 }
 0xb9e   : > { %v1462_v16 = vsub.f32 %v1460_v55, %v1461_v53 }
 0xba0   : > { %v1463_v56 = vmax.f32 %v1294_v49, %v1462_v16 }
 0xbc6   : > { %1523 = vxpose.xlu1.b32.start.end [1/1] (short) (narrow) %v1463_v56, 8 }
 0xc1c   : > { %v1779_v29 = vpop.xlane.xlu1 %1778 }
 0xc1d   : > { %v1780_v57 = vmul.f32 0.03125, %v1779_v29 }
 0xc1f   : > { %v1781_v58 = vadd.f32 1e-05, %v1780_v57 }
 0xc21   : > { %2346 = vrsqrt.f32 %v1781_v58 }
 0xc2e   : > { %v2347_v52 = vpop.eup %2346 }
 0xc2f   : > { %v1783_v27 = vmul.f32 %v2347_v52, %v1775_v37 }
 0xc31   : > { %v1790_v60 = vmul.f32 %v2028_v25, %v1783_v27 }
 0xc33   : > { %v1797_v61 = vadd.f32 %v2029_v59, %v1790_v60 }
 0xc35   : > { %v1798_v62 = vpack.c.bf16 %v1797_v61, %v1797_v61 }
 0xc37   : > { %1800 = vst.msk [vmem:[%s633_s8] sm:$0xf] %vm1799_vm4, %v1798_v62 }
 0xc38   : > { %2491 = shalt.err (!%p2488_p0)
}
 0xc39   : > { %s2492_s29 = scalar_lea.hbm %s1817_s24, 64  ;;  %s2496_s4 = scalar_lea.hbm %s3157_s17, 128 }
 0xc3a   : > { %p2493_p13 = scmp.ne.s32.totalorder %s1817_s24, %s2492_s29  ;;  %p2497_p9 = scmp.lt.s32.totalorder %s1817_s24, %s3157_s17 }
 0xc3b   : > { %p2498_p12 = scmp.lt.s32.totalorder %s2496_s4, %s2492_s29 }
 0xc3c   : > { %p2494_p1 = pnand %p2493_p13, %p3200_p6 }
 0xc3d   : > { %p2499_p3 = por %p2498_p12, %p2497_p9 }
 0xc3e   : > { %p2495_p2 = pneg %p2494_p1 }
 0xc40   : > { %p2500_p5 = pnand %p2499_p3, %p2495_p2 }
 0xc42   : > { %2503 = shalt.err (!%p2500_p5)
}
 0xc43   : > { %2224 = dma.vmem_to_hbm [thread:$0]  (%p3200_p6), %s1820_s22, 64, %s1817_s24, %s1802_s21   ;;  %vm1555_vm5 = vcmask 57344   ;;  %v1539_v1 = vpop.trf.xlu1 }
 0xc44   : > { %s2032_s19 = sshll.u32 %s2710_s0, 4  ;;  %s639_s23 = scalar_lea.vmem [#allocation12], %s3073_s20 }
 0xc45   : > { %s1832_s27 = sshll.u32 %s639_s23, 4  ;;  %s3104_s3 = scalar_lea.hbm %s3158_s18, %s2032_s19  ;;  %1556 = vst.msk [vmem:[%s639_s23] sm:$0x1] %vm1555_vm5, %v1539_v1  ;;  %s1833_s27 = int_to_ptr.vmem [resolvable:$true] %s1832_s27 }
 0xc46   : > { %s1807_s29 = scalar_lea.sflag [#allocation13], %s3073_s20  ;;  %s2504_s8 = scalar_lea.vmem %s1833_s27, 16 }
 0xc47   : > { %p2505_p10 = scmp.ne.s32.totalorder %s1833_s27, %s2504_s8  ;;  %s2593_s4 = smov [#allocation12]  }
 0xc48   : > { %s2508_s22 = sshll.u32 %s2593_s4, 4  ;;  %s2509_s22 = int_to_ptr.vmem [resolvable:$false] %s2508_s22 }
 0xc49   : > { %p2506_p4 = pnand %p2505_p10, %p3200_p6  ;;  %s2510_s0 = scalar_lea.vmem %s2509_s22, 32 }
 0xc4a   : > { %p2511_p8 = scmp.lt.s32.totalorder %s1833_s27, %s2509_s22  ;;  %p2512_p11 = scmp.lt.s32.totalorder %s2510_s0, %s2504_s8 }
 0xc4b   : > { %p2507_p7 = pneg %p2506_p4 }
 0xc4c   : > { %p2513_p0 = por %p2512_p11, %p2511_p8 }
 0xc4e   : > { %p2514_p13 = pnand %p2513_p0, %p2507_p7 }
 0xc50   : > { %2517 = shalt.err (!%p2514_p13)
}
 0xc51   : > { %s2518_s24 = scalar_lea.hbm %s3104_s3, 16  ;;  %s2522_s1 = scalar_lea.hbm %s3158_s18, 32 }
 0xc52   : > { %p2519_p1 = scmp.ne.s32.totalorder %s3104_s3, %s2518_s24  ;;  %p2523_p12 = scmp.lt.s32.totalorder %s3104_s3, %s3158_s18 }
 0xc53   : > { %p2524_p3 = scmp.lt.s32.totalorder %s2522_s1, %s2518_s24 }
 0xc54   : > { %p2520_p2 = pnand %p2519_p1, %p3200_p6 }
 0xc55   : > { %p2525_p5 = por %p2524_p3, %p2523_p12 }
 0xc56   : > { %p2521_p9 = pneg %p2520_p2 }
 0xc58   : > { %p2526_p10 = pnand %p2525_p5, %p2521_p9 }
 0xc5a   : > { %2529 = shalt.err (!%p2526_p10)
}
 0xc5b   : > { %2225 = dma.vmem_to_hbm [thread:$0]  (%p3200_p6), %s1833_s27, 16, %s3104_s3, %s1807_s29  }
 0xc5c PF: > { %s3201_s25 = sld [smem:[#allocation21_spill]] }
 0xc5d   : > { %s3202_s30 = sld [smem:[#allocation19_spill]] }
 0xc5e   : > { %s3203_s8 = sld [smem:[#allocation24_spill]] }
 0xc62   : > { %p2261_p4 = scmp.ge.s32.totalorder %s3201_s25, 2 }
 0xc63   : > { %s1844_s4 = sand.u32 1, %s3202_s30  }
 0xc64   : > { %p3204_p7 = scmp.ne.s32.totalorder %s3203_s8, 0  ;;  %s1845_s22 = scalar_lea.sflag [#allocation4], %s1844_s4 }
 0xc66   : > { %p2245_p8 = pnand %p2261_p4, %p3204_p7 }
 0xc68   : > { %p2246_p11 = pneg %p2245_p8 }
 0xc6a   : > { %2559 = dma.done.wait (%p2246_p11), %s1845_s22, 64  }
 0xc6b   : > { %2561 = vsyncadd (%p2246_p11), %s1845_s22, 4294967232  ;;  %s1854_s0 = scalar_lea.sflag [#allocation13], %s1844_s4 }
 0xc6c   : > { %2563 = dma.done.wait (%p2246_p11), %s1854_s0, 16  }
 0xc6d   : > { %2565 = vsyncadd (%p2246_p11), %s1854_s0, 4294967280  ;;  %s3205_s30 = sld [smem:[#allocation22_spill]]  ;;  %s3208_s27 = smov %s2572_s28 }
 0xc6e   : > { %s3206_s2 = sld [smem:[#allocation20_spill]] }
 0xc6f   : > { %s3207_s29 = sld [smem:[#allocation23_spill]] }
 0xc73   : > { %p35_p6 = scmp.ge.s32.totalorder %s3205_s30, 4  }
 0xc74   : > { %s3209_s28 = smov %s3206_s2 }
 0xc75   :  { %37 = sbr.rel (!%p35_p6) target bundleno = 15 (0xf), region = 164 }
 0xc7a   :  { %1858 = vsyncpa [#allocation3], 1 }
 0xc7b   :  { %1860 = vsyncpa [#allocation3 + $0x1], 1 }
 0xc7c   :  { %1861 = vsyncpa [#allocation6], 1 }
 0xc7d   :  { %1862 = vsyncpa [#allocation9], 1 }
 0xc7e   :  { %1863 = vsyncpa [#allocation4], 1 }
 0xc7f   :  { %1865 = vsyncpa [#allocation4 + $0x1], 1 }
 0xc80   :  { %1866 = vsyncpa [#allocation13], 1 }
 0xc81   :  { %1868 = vsyncpa [#allocation13 + $0x1], 1 }

</bundles_post_ra>
